<compile_context>
chip_gen: v7x
topology: tpu7x:2x2x1
jax: 0.10.0
libtpu: 0.0.40
codegen_flags: <defaults>
</compile_context>

<pallas_src>
import functools

import jax
import jax.numpy as jnp
from jax.experimental import pallas as pl
from jax.experimental.pallas import tpu as pltpu


def _mhsa_kernel(x_ref, wqkv_ref, wo_ref, o_ref, qkv_sc, att_sc,
                 *, num_heads, dim_head):
    # x_ref   : (G, n, dim) f32       block of G (b,p) slabs
    # wqkv_ref: (dim, 3*h*d) bf16     [Wq | Wk | Wv], dim**-0.5 folded into Wq
    # wo_ref  : (h*d, dim)  bf16
    # o_ref   : (G, n, dim)
    # qkv_sc  : (G*n, 3*h*d) bf16 scratch (fused projection result)
    # att_sc  : (G*n, h*d)   bf16 scratch (concatenated per-head outputs)
    G, n, dim = x_ref.shape
    m = G * n
    hd = num_heads * dim_head

    # One big activation slab (leading-dim merge is free), bf16 for the MXU.
    x = x_ref[...].reshape(m, dim).astype(jnp.bfloat16)          # (M, dim)

    # (1) Fused QKV projection: one (M, dim) @ (dim, 3*h*d) matmul, f32 acc.
    qkv_sc[...] = jnp.dot(
        x, wqkv_ref[...], preferred_element_type=jnp.float32
    ).astype(jnp.bfloat16)                                       # (M, 3*h*d)

    # (2) Per-head attention.  The heavy matmuls are outside this loop; what
    # remains per head are tiny (n=8, d=4) score / softmax / AV ops.  Per-head
    # slices are cheap masked lane loads/stores on the bf16 scratch refs.
    for h in range(num_heads):                                   # static, unrolled
        q = qkv_sc[:, pl.ds(h * dim_head, dim_head)].reshape(G, n, dim_head)
        k = qkv_sc[:, pl.ds(hd + h * dim_head, dim_head)].reshape(G, n, dim_head)
        v = qkv_sc[:, pl.ds(2 * hd + h * dim_head, dim_head)].reshape(G, n, dim_head)

        # Scores per slab (single batch dim g); scale already folded into Wq.
        s = jnp.einsum('gnd,gmd->gnm', q, k,
                       preferred_element_type=jnp.float32)       # (G, n, n) f32

        # Numerically-stable softmax in f32; approx reciprocal -> EUP slot.
        s = s - jnp.max(s, axis=-1, keepdims=True)
        e = jnp.exp(s)
        p = e * pl.reciprocal(jnp.sum(e, axis=-1, keepdims=True), approx=True)

        # Attention-weighted values.
        o = jnp.einsum('gnm,gmd->gnd', p.astype(jnp.bfloat16), v,
                       preferred_element_type=jnp.float32)       # (G, n, d)

        # Stash this head's output at its lane offset (== concat over heads).
        att_sc[:, pl.ds(h * dim_head, dim_head)] = (
            o.reshape(m, dim_head).astype(jnp.bfloat16))

    # (3) Fused output projection: one (M, h*d) @ (h*d, dim) matmul; no f32 RMW.
    y = jnp.dot(att_sc[...], wo_ref[...], preferred_element_type=jnp.float32)
    o_ref[...] = y.reshape(G, n, dim).astype(o_ref.dtype)


def _prep_weights(w_qkv, w_out, num_heads, dim_head):
    """Torch-layout weights -> fused bf16 kernel weights (scale folded into Q)."""
    hd = num_heads * dim_head
    dim = w_qkv.shape[1]
    scale = float(dim) ** (-0.5)        # module uses dim**-0.5 (intentional)

    # torch Linear weight layout is (out_features, in_features); y = x @ W.T.
    wq = jnp.swapaxes(w_qkv[0 * hd:1 * hd], 0, 1) * scale        # (dim, h*d)
    wk = jnp.swapaxes(w_qkv[1 * hd:2 * hd], 0, 1)                # (dim, h*d)
    wv = jnp.swapaxes(w_qkv[2 * hd:3 * hd], 0, 1)                # (dim, h*d)
    w_qkv_fused = jnp.concatenate([wq, wk, wv], axis=1).astype(jnp.bfloat16)  # (dim, 3*h*d)
    w_o = jnp.swapaxes(w_out, 0, 1).astype(jnp.bfloat16)          # (h*d, dim)
    return w_qkv_fused, w_o


def multi_head_self_attention(x, w_qkv, w_out, num_heads, dim_head, *, block_slabs=256):
    """x: (b, p, n, dim); w_qkv: (3*h*d, dim) torch layout; w_out: (dim, h*d) torch layout."""
    b, p, n, dim = x.shape
    hd = num_heads * dim_head
    assert w_qkv.shape == (3 * hd, dim)
    assert w_out.shape == (dim, hd)

    B = b * p
    # Guarantee >= 2 grid steps whenever B >= 2 so both v7x TensorCores get work;
    # cap block size for VMEM budgeting (v7x: 64 MiB per TC).
    G = max(1, min(block_slabs, -(-B // 2)))
    num_blocks = -(-B // G)
    Bp = num_blocks * G

    x_flat = x.reshape(B, n, dim)
    if Bp != B:
        x_flat = jnp.pad(x_flat, ((0, Bp - B), (0, 0), (0, 0)))

    w_qkv_fused, w_o = _prep_weights(w_qkv, w_out, num_heads, dim_head)

    kernel = functools.partial(_mhsa_kernel, num_heads=num_heads, dim_head=dim_head)

    out = pl.pallas_call(
        kernel,
        out_shape=jax.ShapeDtypeStruct((Bp, n, dim), x.dtype),
        grid_spec=pltpu.PrefetchScalarGridSpec(
            num_scalar_prefetch=0,
            grid=(num_blocks,),
            in_specs=[
                pl.BlockSpec((G, n, dim), lambda i: (i, 0, 0)),
                pl.BlockSpec((dim, 3 * hd), lambda i: (0, 0)),
                pl.BlockSpec((hd, dim), lambda i: (0, 0)),
            ],
            out_specs=pl.BlockSpec((G, n, dim), lambda i: (i, 0, 0)),
            scratch_shapes=[
                pltpu.VMEM((G * n, 3 * hd), jnp.bfloat16),
                pltpu.VMEM((G * n, hd), jnp.bfloat16),
            ],
        ),
        compiler_params=pltpu.CompilerParams(
            dimension_semantics=("parallel",),
            vmem_limit_bytes=48 * 1024 * 1024,
        ),
    )(x_flat, w_qkv_fused, w_o)

    return out[:B].reshape(b, p, n, dim)


def _reference_kernel_precision(x, w_qkv_fused, w_o, num_heads, dim_head):
    """Plain-JAX reference mirroring the kernel's bf16/f32 precision choices."""
    f32 = jnp.float32
    b, p, n, dim = x.shape
    hd = num_heads * dim_head
    xb = x.astype(jnp.bfloat16)
    qkv = jnp.einsum('bpnc,co->bpno', xb, w_qkv_fused,
                     preferred_element_type=f32).astype(jnp.bfloat16)
    q, k, v = qkv[..., :hd], qkv[..., hd:2 * hd], qkv[..., 2 * hd:]

    def to_heads(t):
        return t.reshape(b, p, n, num_heads, dim_head).transpose(0, 1, 3, 2, 4)

    q, k, v = map(to_heads, (q, k, v))
    s = jnp.einsum('bphnd,bphmd->bphnm', q, k, preferred_element_type=f32)
    a = jax.nn.softmax(s, axis=-1)
    o = jnp.einsum('bphnm,bphmd->bphnd', a.astype(jnp.bfloat16), v,
                   preferred_element_type=f32)
    o = o.transpose(0, 1, 3, 2, 4).reshape(b, p, n, hd).astype(jnp.bfloat16)
    return jnp.einsum('bpno,od->bpnd', o, w_o, preferred_element_type=f32)


def _reference_f32(x, w_qkv, w_out, num_heads, dim_head):
    """Plain-JAX reference reproducing the PyTorch module forward (f32 weights)."""
    b, p, n, dim = x.shape
    hd = num_heads * dim_head
    scale = float(dim) ** (-0.5)
    qkv = jnp.einsum('bpnd,od->bpno', x, w_qkv)
    q, k, v = jnp.split(qkv, 3, axis=-1)

    def to_heads(t):
        return t.reshape(b, p, n, num_heads, dim_head).transpose(0, 1, 3, 2, 4)

    q, k, v = map(to_heads, (q, k, v))
    dots = jnp.einsum('bphnd,bphmd->bphnm', q, k) * scale
    attn = jax.nn.softmax(dots, axis=-1)
    out = jnp.einsum('bphnm,bphmd->bphnd', attn, v)
    out = out.transpose(0, 1, 3, 2, 4).reshape(b, p, n, hd)
    return jnp.einsum('bpno,do->bpnd', out, w_out)


if __name__ == "__main__":
    # Small shapes consistent with the module.
    b, p, n, dim = 2, 4, 8, 32
    num_heads = 8
    dim_head = dim // num_heads       # default dim_head=None -> dim/num_heads = 4
    hd = num_heads * dim_head

    key = jax.random.PRNGKey(0)
    kx, kqkv, kout = jax.random.split(key, 3)

    x = jax.random.normal(kx, (b, p, n, dim), dtype=jnp.float32)
    # torch Linear weight layout: (out_features, in_features)
    w_qkv = jax.random.normal(kqkv, (3 * hd, dim), dtype=jnp.float32) * (dim ** -0.5)
    w_out = jax.random.normal(kout, (dim, hd), dtype=jnp.float32) * (hd ** -0.5)

    y = multi_head_self_attention(x, w_qkv, w_out, num_heads, dim_head)
    y = jax.block_until_ready(y)
    assert y.shape == (b, p, n, dim)
    assert bool(jnp.all(jnp.isfinite(y)))

    # Primary check: reference with the same bf16/f32 precision as the kernel.
    w_qkv_fused, w_o = _prep_weights(w_qkv, w_out, num_heads, dim_head)
    y_bf = _reference_kernel_precision(x, w_qkv_fused, w_o, num_heads, dim_head)
    assert jnp.allclose(y, y_bf, atol=2e-2, rtol=2e-2), "mismatch vs precision-matched reference"

    # Sanity check: full-precision module semantics (loose tolerance for bf16 MXU inputs).
    y_f32 = _reference_f32(x, w_qkv, w_out, num_heads, dim_head)
    assert jnp.allclose(y, y_f32, atol=1e-1, rtol=1e-1), "mismatch vs f32 module reference"

    print("KERNEL_OK")
</pallas_src>

<mosaic_0001>
module attributes {stable_mosaic.version = 11 : i64} {
  func.func @_mhsa_kernel(%arg0: i32, %arg1: memref<4x8x32xf32, #tpu.memory_space<vmem>>, %arg2: memref<32x96xbf16, #tpu.memory_space<vmem>>, %arg3: memref<32x32xbf16, #tpu.memory_space<vmem>>, %arg4: memref<4x8x32xf32, #tpu.memory_space<vmem>>, %arg5: memref<32x96xbf16, #tpu.memory_space<vmem>>, %arg6: memref<32x32xbf16, #tpu.memory_space<vmem>>) attributes {dimension_semantics = [#tpu.dimension_semantics<parallel>], iteration_bounds = array<i64: 2>, scalar_prefetch = 0 : i64, scratch_operands = 2 : i64, tpu.core_type = #tpu.core_type<tc>, window_params = [{transform_indices = @transform_0, window_bounds = array<i64: 4, 8, 32>}, {pipeline_mode = #tpu.pipeline_mode<synchronous>, transform_indices = @transform_1, window_bounds = array<i64: 32, 96>}, {pipeline_mode = #tpu.pipeline_mode<synchronous>, transform_indices = @transform_2, window_bounds = array<i64: 32, 32>}, {transform_indices = @transform_3, window_bounds = array<i64: 4, 8, 32>}]} {
    %c0 = arith.constant 0 : index
    %c0_0 = arith.constant 0 : index
    %c0_1 = arith.constant 0 : index
    %0 = vector.load %arg1[%c0, %c0_0, %c0_1] : memref<4x8x32xf32, #tpu.memory_space<vmem>>, vector<4x8x32xf32>
    %1 = vector.shape_cast %0 : vector<4x8x32xf32> to vector<32x32xf32>
    %2 = arith.truncf %1 : vector<32x32xf32> to vector<32x32xbf16>
    %c0_2 = arith.constant 0 : index
    %c0_3 = arith.constant 0 : index
    %3 = vector.load %arg2[%c0_2, %c0_3] : memref<32x96xbf16, #tpu.memory_space<vmem>>, vector<32x96xbf16>
    %cst = arith.constant dense<0.000000e+00> : vector<32x96xf32>
    %4 = tpu.matmul %2, %3, %cst {dimension_numbers = #tpu.dot_dimension_numbers<[1], [0], [0], [1], [0, 0, 1, 1], [], []>} : vector<32x32xbf16>, vector<32x96xbf16>, vector<32x96xf32> -> vector<32x96xf32>
    %5 = arith.truncf %4 : vector<32x96xf32> to vector<32x96xbf16>
    %c0_4 = arith.constant 0 : index
    %c0_5 = arith.constant 0 : index
    %6 = vector.load %arg5[%c0_4, %c0_5] : memref<32x96xbf16, #tpu.memory_space<vmem>>, vector<32x96xbf16>
    tpu.vector_store %arg5[%c0_4, %c0_5], %5 {strides = array<i32>} : memref<32x96xbf16, #tpu.memory_space<vmem>>, vector<32x96xbf16>,
    %c0_6 = arith.constant 0 : index
    %c0_7 = arith.constant 0 : index
    %7 = vector.load %arg5[%c0_6, %c0_7] : memref<32x96xbf16, #tpu.memory_space<vmem>>, vector<32x4xbf16>
    %8 = vector.shape_cast %7 : vector<32x4xbf16> to vector<4x8x4xbf16>
    %c0_8 = arith.constant 0 : index
    %c32 = arith.constant 32 : index
    %9 = vector.load %arg5[%c0_8, %c32] : memref<32x96xbf16, #tpu.memory_space<vmem>>, vector<32x4xbf16>
    %10 = vector.shape_cast %9 : vector<32x4xbf16> to vector<4x8x4xbf16>
    %c0_9 = arith.constant 0 : index
    %c64 = arith.constant 64 : index
    %11 = vector.load %arg5[%c0_9, %c64] : memref<32x96xbf16, #tpu.memory_space<vmem>>, vector<32x4xbf16>
    %12 = vector.shape_cast %11 : vector<32x4xbf16> to vector<4x8x4xbf16>
    "tpu.trace_start"() <{level = 10 : i32, message = "gnd,gmd->gnm"}> : () -> ()
    %cst_10 = arith.constant dense<0.000000e+00> : vector<4x8x8xf32>
    %13 = tpu.matmul %8, %10, %cst_10 {dimension_numbers = #tpu.dot_dimension_numbers<[2], [2], [1], [1], [0, 0, 0, 1, 1, 1], [0], [0]>} : vector<4x8x4xbf16>, vector<4x8x4xbf16>, vector<4x8x8xf32> -> vector<4x8x8xf32>
    "tpu.trace_stop"() : () -> ()
    %cst_11 = arith.constant dense<0xFF800000> : vector<4x8xf32>
    %14 = vector.multi_reduction <maximumf>, %13, %cst_11 [2] : vector<4x8x8xf32> to vector<4x8xf32>
    %15 = vector.shape_cast %14 : vector<4x8xf32> to vector<4x8x1xf32>
    %16 = vector.broadcast %15 : vector<4x8x1xf32> to vector<4x8x8xf32>
    %17 = arith.subf %13, %16 : vector<4x8x8xf32>
    %18 = math.exp %17 : vector<4x8x8xf32>
    %cst_12 = arith.constant dense<0.000000e+00> : vector<4x8xf32>
    %19 = vector.multi_reduction <add>, %18, %cst_12 [2] : vector<4x8x8xf32> to vector<4x8xf32>
    %20 = vector.shape_cast %19 : vector<4x8xf32> to vector<4x8x1xf32>
    %21 = tpu.reciprocal %20 {approx = true} : vector<4x8x1xf32> -> vector<4x8x1xf32>
    %22 = vector.broadcast %21 : vector<4x8x1xf32> to vector<4x8x8xf32>
    %23 = arith.mulf %18, %22 : vector<4x8x8xf32>
    %24 = arith.truncf %23 : vector<4x8x8xf32> to vector<4x8x8xbf16>
    "tpu.trace_start"() <{level = 10 : i32, message = "gnm,gmd->gnd"}> : () -> ()
    %cst_13 = arith.constant dense<0.000000e+00> : vector<4x8x4xf32>
    %25 = tpu.matmul %24, %12, %cst_13 {dimension_numbers = #tpu.dot_dimension_numbers<[2], [1], [1], [2], [0, 0, 0, 1, 1, 2], [0], [0]>} : vector<4x8x8xbf16>, vector<4x8x4xbf16>, vector<4x8x4xf32> -> vector<4x8x4xf32>
    "tpu.trace_stop"() : () -> ()
    %26 = vector.shape_cast %25 : vector<4x8x4xf32> to vector<32x4xf32>
    %27 = arith.truncf %26 : vector<32x4xf32> to vector<32x4xbf16>
    %c0_14 = arith.constant 0 : index
    %c0_15 = arith.constant 0 : index
    %28 = vector.load %arg6[%c0_14, %c0_15] : memref<32x32xbf16, #tpu.memory_space<vmem>>, vector<32x4xbf16>
    tpu.vector_store %arg6[%c0_14, %c0_15], %27 {strides = array<i32>} : memref<32x32xbf16, #tpu.memory_space<vmem>>, vector<32x4xbf16>,
    %c0_16 = arith.constant 0 : index
    %c4 = arith.constant 4 : index
    %29 = vector.load %arg5[%c0_16, %c4] : memref<32x96xbf16, #tpu.memory_space<vmem>>, vector<32x4xbf16>
    %30 = vector.shape_cast %29 : vector<32x4xbf16> to vector<4x8x4xbf16>
    %c0_17 = arith.constant 0 : index
    %c36 = arith.constant 36 : index
    %31 = vector.load %arg5[%c0_17, %c36] : memref<32x96xbf16, #tpu.memory_space<vmem>>, vector<32x4xbf16>
    %32 = vector.shape_cast %31 : vector<32x4xbf16> to vector<4x8x4xbf16>
    %c0_18 = arith.constant 0 : index
    %c68 = arith.constant 68 : index
    %33 = vector.load %arg5[%c0_18, %c68] : memref<32x96xbf16, #tpu.memory_space<vmem>>, vector<32x4xbf16>
    %34 = vector.shape_cast %33 : vector<32x4xbf16> to vector<4x8x4xbf16>
    "tpu.trace_start"() <{level = 10 : i32, message = "gnd,gmd->gnm"}> : () -> ()
    %cst_19 = arith.constant dense<0.000000e+00> : vector<4x8x8xf32>
    %35 = tpu.matmul %30, %32, %cst_19 {dimension_numbers = #tpu.dot_dimension_numbers<[2], [2], [1], [1], [0, 0, 0, 1, 1, 1], [0], [0]>} : vector<4x8x4xbf16>, vector<4x8x4xbf16>, vector<4x8x8xf32> -> vector<4x8x8xf32>
    "tpu.trace_stop"() : () -> ()
    %cst_20 = arith.constant dense<0xFF800000> : vector<4x8xf32>
    %36 = vector.multi_reduction <maximumf>, %35, %cst_20 [2] : vector<4x8x8xf32> to vector<4x8xf32>
    %37 = vector.shape_cast %36 : vector<4x8xf32> to vector<4x8x1xf32>
    %38 = vector.broadcast %37 : vector<4x8x1xf32> to vector<4x8x8xf32>
    %39 = arith.subf %35, %38 : vector<4x8x8xf32>
    %40 = math.exp %39 : vector<4x8x8xf32>
    %cst_21 = arith.constant dense<0.000000e+00> : vector<4x8xf32>
    %41 = vector.multi_reduction <add>, %40, %cst_21 [2] : vector<4x8x8xf32> to vector<4x8xf32>
    %42 = vector.shape_cast %41 : vector<4x8xf32> to vector<4x8x1xf32>
    %43 = tpu.reciprocal %42 {approx = true} : vector<4x8x1xf32> -> vector<4x8x1xf32>
    %44 = vector.broadcast %43 : vector<4x8x1xf32> to vector<4x8x8xf32>
    %45 = arith.mulf %40, %44 : vector<4x8x8xf32>
    %46 = arith.truncf %45 : vector<4x8x8xf32> to vector<4x8x8xbf16>
    "tpu.trace_start"() <{level = 10 : i32, message = "gnm,gmd->gnd"}> : () -> ()
    %cst_22 = arith.constant dense<0.000000e+00> : vector<4x8x4xf32>
    %47 = tpu.matmul %46, %34, %cst_22 {dimension_numbers = #tpu.dot_dimension_numbers<[2], [1], [1], [2], [0, 0, 0, 1, 1, 2], [0], [0]>} : vector<4x8x8xbf16>, vector<4x8x4xbf16>, vector<4x8x4xf32> -> vector<4x8x4xf32>
    "tpu.trace_stop"() : () -> ()
    %48 = vector.shape_cast %47 : vector<4x8x4xf32> to vector<32x4xf32>
    %49 = arith.truncf %48 : vector<32x4xf32> to vector<32x4xbf16>
    %c0_23 = arith.constant 0 : index
    %c4_24 = arith.constant 4 : index
    %50 = vector.load %arg6[%c0_23, %c4_24] : memref<32x32xbf16, #tpu.memory_space<vmem>>, vector<32x4xbf16>
    tpu.vector_store %arg6[%c0_23, %c4_24], %49 {strides = array<i32>} : memref<32x32xbf16, #tpu.memory_space<vmem>>, vector<32x4xbf16>,
    %c0_25 = arith.constant 0 : index
    %c8 = arith.constant 8 : index
    %51 = vector.load %arg5[%c0_25, %c8] : memref<32x96xbf16, #tpu.memory_space<vmem>>, vector<32x4xbf16>
    %52 = vector.shape_cast %51 : vector<32x4xbf16> to vector<4x8x4xbf16>
    %c0_26 = arith.constant 0 : index
    %c40 = arith.constant 40 : index
    %53 = vector.load %arg5[%c0_26, %c40] : memref<32x96xbf16, #tpu.memory_space<vmem>>, vector<32x4xbf16>
    %54 = vector.shape_cast %53 : vector<32x4xbf16> to vector<4x8x4xbf16>
    %c0_27 = arith.constant 0 : index
    %c72 = arith.constant 72 : index
    %55 = vector.load %arg5[%c0_27, %c72] : memref<32x96xbf16, #tpu.memory_space<vmem>>, vector<32x4xbf16>
    %56 = vector.shape_cast %55 : vector<32x4xbf16> to vector<4x8x4xbf16>
    "tpu.trace_start"() <{level = 10 : i32, message = "gnd,gmd->gnm"}> : () -> ()
    %cst_28 = arith.constant dense<0.000000e+00> : vector<4x8x8xf32>
    %57 = tpu.matmul %52, %54, %cst_28 {dimension_numbers = #tpu.dot_dimension_numbers<[2], [2], [1], [1], [0, 0, 0, 1, 1, 1], [0], [0]>} : vector<4x8x4xbf16>, vector<4x8x4xbf16>, vector<4x8x8xf32> -> vector<4x8x8xf32>
    "tpu.trace_stop"() : () -> ()
    %cst_29 = arith.constant dense<0xFF800000> : vector<4x8xf32>
    %58 = vector.multi_reduction <maximumf>, %57, %cst_29 [2] : vector<4x8x8xf32> to vector<4x8xf32>
    %59 = vector.shape_cast %58 : vector<4x8xf32> to vector<4x8x1xf32>
    %60 = vector.broadcast %59 : vector<4x8x1xf32> to vector<4x8x8xf32>
    %61 = arith.subf %57, %60 : vector<4x8x8xf32>
    %62 = math.exp %61 : vector<4x8x8xf32>
    %cst_30 = arith.constant dense<0.000000e+00> : vector<4x8xf32>
    %63 = vector.multi_reduction <add>, %62, %cst_30 [2] : vector<4x8x8xf32> to vector<4x8xf32>
    %64 = vector.shape_cast %63 : vector<4x8xf32> to vector<4x8x1xf32>
    %65 = tpu.reciprocal %64 {approx = true} : vector<4x8x1xf32> -> vector<4x8x1xf32>
    %66 = vector.broadcast %65 : vector<4x8x1xf32> to vector<4x8x8xf32>
    %67 = arith.mulf %62, %66 : vector<4x8x8xf32>
    %68 = arith.truncf %67 : vector<4x8x8xf32> to vector<4x8x8xbf16>
    "tpu.trace_start"() <{level = 10 : i32, message = "gnm,gmd->gnd"}> : () -> ()
    %cst_31 = arith.constant dense<0.000000e+00> : vector<4x8x4xf32>
    %69 = tpu.matmul %68, %56, %cst_31 {dimension_numbers = #tpu.dot_dimension_numbers<[2], [1], [1], [2], [0, 0, 0, 1, 1, 2], [0], [0]>} : vector<4x8x8xbf16>, vector<4x8x4xbf16>, vector<4x8x4xf32> -> vector<4x8x4xf32>
    "tpu.trace_stop"() : () -> ()
    %70 = vector.shape_cast %69 : vector<4x8x4xf32> to vector<32x4xf32>
    %71 = arith.truncf %70 : vector<32x4xf32> to vector<32x4xbf16>
    %c0_32 = arith.constant 0 : index
    %c8_33 = arith.constant 8 : index
    %72 = vector.load %arg6[%c0_32, %c8_33] : memref<32x32xbf16, #tpu.memory_space<vmem>>, vector<32x4xbf16>
    tpu.vector_store %arg6[%c0_32, %c8_33], %71 {strides = array<i32>} : memref<32x32xbf16, #tpu.memory_space<vmem>>, vector<32x4xbf16>,
    %c0_34 = arith.constant 0 : index
    %c12 = arith.constant 12 : index
    %73 = vector.load %arg5[%c0_34, %c12] : memref<32x96xbf16, #tpu.memory_space<vmem>>, vector<32x4xbf16>
    %74 = vector.shape_cast %73 : vector<32x4xbf16> to vector<4x8x4xbf16>
    %c0_35 = arith.constant 0 : index
    %c44 = arith.constant 44 : index
    %75 = vector.load %arg5[%c0_35, %c44] : memref<32x96xbf16, #tpu.memory_space<vmem>>, vector<32x4xbf16>
    %76 = vector.shape_cast %75 : vector<32x4xbf16> to vector<4x8x4xbf16>
    %c0_36 = arith.constant 0 : index
    %c76 = arith.constant 76 : index
    %77 = vector.load %arg5[%c0_36, %c76] : memref<32x96xbf16, #tpu.memory_space<vmem>>, vector<32x4xbf16>
    %78 = vector.shape_cast %77 : vector<32x4xbf16> to vector<4x8x4xbf16>
    "tpu.trace_start"() <{level = 10 : i32, message = "gnd,gmd->gnm"}> : () -> ()
    %cst_37 = arith.constant dense<0.000000e+00> : vector<4x8x8xf32>
    %79 = tpu.matmul %74, %76, %cst_37 {dimension_numbers = #tpu.dot_dimension_numbers<[2], [2], [1], [1], [0, 0, 0, 1, 1, 1], [0], [0]>} : vector<4x8x4xbf16>, vector<4x8x4xbf16>, vector<4x8x8xf32> -> vector<4x8x8xf32>
    "tpu.trace_stop"() : () -> ()
    %cst_38 = arith.constant dense<0xFF800000> : vector<4x8xf32>
    %80 = vector.multi_reduction <maximumf>, %79, %cst_38 [2] : vector<4x8x8xf32> to vector<4x8xf32>
    %81 = vector.shape_cast %80 : vector<4x8xf32> to vector<4x8x1xf32>
    %82 = vector.broadcast %81 : vector<4x8x1xf32> to vector<4x8x8xf32>
    %83 = arith.subf %79, %82 : vector<4x8x8xf32>
    %84 = math.exp %83 : vector<4x8x8xf32>
    %cst_39 = arith.constant dense<0.000000e+00> : vector<4x8xf32>
    %85 = vector.multi_reduction <add>, %84, %cst_39 [2] : vector<4x8x8xf32> to vector<4x8xf32>
    %86 = vector.shape_cast %85 : vector<4x8xf32> to vector<4x8x1xf32>
    %87 = tpu.reciprocal %86 {approx = true} : vector<4x8x1xf32> -> vector<4x8x1xf32>
    %88 = vector.broadcast %87 : vector<4x8x1xf32> to vector<4x8x8xf32>
    %89 = arith.mulf %84, %88 : vector<4x8x8xf32>
    %90 = arith.truncf %89 : vector<4x8x8xf32> to vector<4x8x8xbf16>
    "tpu.trace_start"() <{level = 10 : i32, message = "gnm,gmd->gnd"}> : () -> ()
    %cst_40 = arith.constant dense<0.000000e+00> : vector<4x8x4xf32>
    %91 = tpu.matmul %90, %78, %cst_40 {dimension_numbers = #tpu.dot_dimension_numbers<[2], [1], [1], [2], [0, 0, 0, 1, 1, 2], [0], [0]>} : vector<4x8x8xbf16>, vector<4x8x4xbf16>, vector<4x8x4xf32> -> vector<4x8x4xf32>
    "tpu.trace_stop"() : () -> ()
    %92 = vector.shape_cast %91 : vector<4x8x4xf32> to vector<32x4xf32>
    %93 = arith.truncf %92 : vector<32x4xf32> to vector<32x4xbf16>
    %c0_41 = arith.constant 0 : index
    %c12_42 = arith.constant 12 : index
    %94 = vector.load %arg6[%c0_41, %c12_42] : memref<32x32xbf16, #tpu.memory_space<vmem>>, vector<32x4xbf16>
    tpu.vector_store %arg6[%c0_41, %c12_42], %93 {strides = array<i32>} : memref<32x32xbf16, #tpu.memory_space<vmem>>, vector<32x4xbf16>,
    %c0_43 = arith.constant 0 : index
    %c16 = arith.constant 16 : index
    %95 = vector.load %arg5[%c0_43, %c16] : memref<32x96xbf16, #tpu.memory_space<vmem>>, vector<32x4xbf16>
    %96 = vector.shape_cast %95 : vector<32x4xbf16> to vector<4x8x4xbf16>
    %c0_44 = arith.constant 0 : index
    %c48 = arith.constant 48 : index
    %97 = vector.load %arg5[%c0_44, %c48] : memref<32x96xbf16, #tpu.memory_space<vmem>>, vector<32x4xbf16>
    %98 = vector.shape_cast %97 : vector<32x4xbf16> to vector<4x8x4xbf16>
    %c0_45 = arith.constant 0 : index
    %c80 = arith.constant 80 : index
    %99 = vector.load %arg5[%c0_45, %c80] : memref<32x96xbf16, #tpu.memory_space<vmem>>, vector<32x4xbf16>
    %100 = vector.shape_cast %99 : vector<32x4xbf16> to vector<4x8x4xbf16>
    "tpu.trace_start"() <{level = 10 : i32, message = "gnd,gmd->gnm"}> : () -> ()
    %cst_46 = arith.constant dense<0.000000e+00> : vector<4x8x8xf32>
    %101 = tpu.matmul %96, %98, %cst_46 {dimension_numbers = #tpu.dot_dimension_numbers<[2], [2], [1], [1], [0, 0, 0, 1, 1, 1], [0], [0]>} : vector<4x8x4xbf16>, vector<4x8x4xbf16>, vector<4x8x8xf32> -> vector<4x8x8xf32>
    "tpu.trace_stop"() : () -> ()
    %cst_47 = arith.constant dense<0xFF800000> : vector<4x8xf32>
    %102 = vector.multi_reduction <maximumf>, %101, %cst_47 [2] : vector<4x8x8xf32> to vector<4x8xf32>
    %103 = vector.shape_cast %102 : vector<4x8xf32> to vector<4x8x1xf32>
    %104 = vector.broadcast %103 : vector<4x8x1xf32> to vector<4x8x8xf32>
    %105 = arith.subf %101, %104 : vector<4x8x8xf32>
    %106 = math.exp %105 : vector<4x8x8xf32>
    %cst_48 = arith.constant dense<0.000000e+00> : vector<4x8xf32>
    %107 = vector.multi_reduction <add>, %106, %cst_48 [2] : vector<4x8x8xf32> to vector<4x8xf32>
    %108 = vector.shape_cast %107 : vector<4x8xf32> to vector<4x8x1xf32>
    %109 = tpu.reciprocal %108 {approx = true} : vector<4x8x1xf32> -> vector<4x8x1xf32>
    %110 = vector.broadcast %109 : vector<4x8x1xf32> to vector<4x8x8xf32>
    %111 = arith.mulf %106, %110 : vector<4x8x8xf32>
    %112 = arith.truncf %111 : vector<4x8x8xf32> to vector<4x8x8xbf16>
    "tpu.trace_start"() <{level = 10 : i32, message = "gnm,gmd->gnd"}> : () -> ()
    %cst_49 = arith.constant dense<0.000000e+00> : vector<4x8x4xf32>
    %113 = tpu.matmul %112, %100, %cst_49 {dimension_numbers = #tpu.dot_dimension_numbers<[2], [1], [1], [2], [0, 0, 0, 1, 1, 2], [0], [0]>} : vector<4x8x8xbf16>, vector<4x8x4xbf16>, vector<4x8x4xf32> -> vector<4x8x4xf32>
    "tpu.trace_stop"() : () -> ()
    %114 = vector.shape_cast %113 : vector<4x8x4xf32> to vector<32x4xf32>
    %115 = arith.truncf %114 : vector<32x4xf32> to vector<32x4xbf16>
    %c0_50 = arith.constant 0 : index
    %c16_51 = arith.constant 16 : index
    %116 = vector.load %arg6[%c0_50, %c16_51] : memref<32x32xbf16, #tpu.memory_space<vmem>>, vector<32x4xbf16>
    tpu.vector_store %arg6[%c0_50, %c16_51], %115 {strides = array<i32>} : memref<32x32xbf16, #tpu.memory_space<vmem>>, vector<32x4xbf16>,
    %c0_52 = arith.constant 0 : index
    %c20 = arith.constant 20 : index
    %117 = vector.load %arg5[%c0_52, %c20] : memref<32x96xbf16, #tpu.memory_space<vmem>>, vector<32x4xbf16>
    %118 = vector.shape_cast %117 : vector<32x4xbf16> to vector<4x8x4xbf16>
    %c0_53 = arith.constant 0 : index
    %c52 = arith.constant 52 : index
    %119 = vector.load %arg5[%c0_53, %c52] : memref<32x96xbf16, #tpu.memory_space<vmem>>, vector<32x4xbf16>
    %120 = vector.shape_cast %119 : vector<32x4xbf16> to vector<4x8x4xbf16>
    %c0_54 = arith.constant 0 : index
    %c84 = arith.constant 84 : index
    %121 = vector.load %arg5[%c0_54, %c84] : memref<32x96xbf16, #tpu.memory_space<vmem>>, vector<32x4xbf16>
    %122 = vector.shape_cast %121 : vector<32x4xbf16> to vector<4x8x4xbf16>
    "tpu.trace_start"() <{level = 10 : i32, message = "gnd,gmd->gnm"}> : () -> ()
    %cst_55 = arith.constant dense<0.000000e+00> : vector<4x8x8xf32>
    %123 = tpu.matmul %118, %120, %cst_55 {dimension_numbers = #tpu.dot_dimension_numbers<[2], [2], [1], [1], [0, 0, 0, 1, 1, 1], [0], [0]>} : vector<4x8x4xbf16>, vector<4x8x4xbf16>, vector<4x8x8xf32> -> vector<4x8x8xf32>
    "tpu.trace_stop"() : () -> ()
    %cst_56 = arith.constant dense<0xFF800000> : vector<4x8xf32>
    %124 = vector.multi_reduction <maximumf>, %123, %cst_56 [2] : vector<4x8x8xf32> to vector<4x8xf32>
    %125 = vector.shape_cast %124 : vector<4x8xf32> to vector<4x8x1xf32>
    %126 = vector.broadcast %125 : vector<4x8x1xf32> to vector<4x8x8xf32>
    %127 = arith.subf %123, %126 : vector<4x8x8xf32>
    %128 = math.exp %127 : vector<4x8x8xf32>
    %cst_57 = arith.constant dense<0.000000e+00> : vector<4x8xf32>
    %129 = vector.multi_reduction <add>, %128, %cst_57 [2] : vector<4x8x8xf32> to vector<4x8xf32>
    %130 = vector.shape_cast %129 : vector<4x8xf32> to vector<4x8x1xf32>
    %131 = tpu.reciprocal %130 {approx = true} : vector<4x8x1xf32> -> vector<4x8x1xf32>
    %132 = vector.broadcast %131 : vector<4x8x1xf32> to vector<4x8x8xf32>
    %133 = arith.mulf %128, %132 : vector<4x8x8xf32>
    %134 = arith.truncf %133 : vector<4x8x8xf32> to vector<4x8x8xbf16>
    "tpu.trace_start"() <{level = 10 : i32, message = "gnm,gmd->gnd"}> : () -> ()
    %cst_58 = arith.constant dense<0.000000e+00> : vector<4x8x4xf32>
    %135 = tpu.matmul %134, %122, %cst_58 {dimension_numbers = #tpu.dot_dimension_numbers<[2], [1], [1], [2], [0, 0, 0, 1, 1, 2], [0], [0]>} : vector<4x8x8xbf16>, vector<4x8x4xbf16>, vector<4x8x4xf32> -> vector<4x8x4xf32>
    "tpu.trace_stop"() : () -> ()
    %136 = vector.shape_cast %135 : vector<4x8x4xf32> to vector<32x4xf32>
    %137 = arith.truncf %136 : vector<32x4xf32> to vector<32x4xbf16>
    %c0_59 = arith.constant 0 : index
    %c20_60 = arith.constant 20 : index
    %138 = vector.load %arg6[%c0_59, %c20_60] : memref<32x32xbf16, #tpu.memory_space<vmem>>, vector<32x4xbf16>
    tpu.vector_store %arg6[%c0_59, %c20_60], %137 {strides = array<i32>} : memref<32x32xbf16, #tpu.memory_space<vmem>>, vector<32x4xbf16>,
    %c0_61 = arith.constant 0 : index
    %c24 = arith.constant 24 : index
    %139 = vector.load %arg5[%c0_61, %c24] : memref<32x96xbf16, #tpu.memory_space<vmem>>, vector<32x4xbf16>
    %140 = vector.shape_cast %139 : vector<32x4xbf16> to vector<4x8x4xbf16>
    %c0_62 = arith.constant 0 : index
    %c56 = arith.constant 56 : index
    %141 = vector.load %arg5[%c0_62, %c56] : memref<32x96xbf16, #tpu.memory_space<vmem>>, vector<32x4xbf16>
    %142 = vector.shape_cast %141 : vector<32x4xbf16> to vector<4x8x4xbf16>
    %c0_63 = arith.constant 0 : index
    %c88 = arith.constant 88 : index
    %143 = vector.load %arg5[%c0_63, %c88] : memref<32x96xbf16, #tpu.memory_space<vmem>>, vector<32x4xbf16>
    %144 = vector.shape_cast %143 : vector<32x4xbf16> to vector<4x8x4xbf16>
    "tpu.trace_start"() <{level = 10 : i32, message = "gnd,gmd->gnm"}> : () -> ()
    %cst_64 = arith.constant dense<0.000000e+00> : vector<4x8x8xf32>
    %145 = tpu.matmul %140, %142, %cst_64 {dimension_numbers = #tpu.dot_dimension_numbers<[2], [2], [1], [1], [0, 0, 0, 1, 1, 1], [0], [0]>} : vector<4x8x4xbf16>, vector<4x8x4xbf16>, vector<4x8x8xf32> -> vector<4x8x8xf32>
    "tpu.trace_stop"() : () -> ()
    %cst_65 = arith.constant dense<0xFF800000> : vector<4x8xf32>
    %146 = vector.multi_reduction <maximumf>, %145, %cst_65 [2] : vector<4x8x8xf32> to vector<4x8xf32>
    %147 = vector.shape_cast %146 : vector<4x8xf32> to vector<4x8x1xf32>
    %148 = vector.broadcast %147 : vector<4x8x1xf32> to vector<4x8x8xf32>
    %149 = arith.subf %145, %148 : vector<4x8x8xf32>
    %150 = math.exp %149 : vector<4x8x8xf32>
    %cst_66 = arith.constant dense<0.000000e+00> : vector<4x8xf32>
    %151 = vector.multi_reduction <add>, %150, %cst_66 [2] : vector<4x8x8xf32> to vector<4x8xf32>
    %152 = vector.shape_cast %151 : vector<4x8xf32> to vector<4x8x1xf32>
    %153 = tpu.reciprocal %152 {approx = true} : vector<4x8x1xf32> -> vector<4x8x1xf32>
    %154 = vector.broadcast %153 : vector<4x8x1xf32> to vector<4x8x8xf32>
    %155 = arith.mulf %150, %154 : vector<4x8x8xf32>
    %156 = arith.truncf %155 : vector<4x8x8xf32> to vector<4x8x8xbf16>
    "tpu.trace_start"() <{level = 10 : i32, message = "gnm,gmd->gnd"}> : () -> ()
    %cst_67 = arith.constant dense<0.000000e+00> : vector<4x8x4xf32>
    %157 = tpu.matmul %156, %144, %cst_67 {dimension_numbers = #tpu.dot_dimension_numbers<[2], [1], [1], [2], [0, 0, 0, 1, 1, 2], [0], [0]>} : vector<4x8x8xbf16>, vector<4x8x4xbf16>, vector<4x8x4xf32> -> vector<4x8x4xf32>
    "tpu.trace_stop"() : () -> ()
    %158 = vector.shape_cast %157 : vector<4x8x4xf32> to vector<32x4xf32>
    %159 = arith.truncf %158 : vector<32x4xf32> to vector<32x4xbf16>
    %c0_68 = arith.constant 0 : index
    %c24_69 = arith.constant 24 : index
    %160 = vector.load %arg6[%c0_68, %c24_69] : memref<32x32xbf16, #tpu.memory_space<vmem>>, vector<32x4xbf16>
    tpu.vector_store %arg6[%c0_68, %c24_69], %159 {strides = array<i32>} : memref<32x32xbf16, #tpu.memory_space<vmem>>, vector<32x4xbf16>,
    %c0_70 = arith.constant 0 : index
    %c28 = arith.constant 28 : index
    %161 = vector.load %arg5[%c0_70, %c28] : memref<32x96xbf16, #tpu.memory_space<vmem>>, vector<32x4xbf16>
    %162 = vector.shape_cast %161 : vector<32x4xbf16> to vector<4x8x4xbf16>
    %c0_71 = arith.constant 0 : index
    %c60 = arith.constant 60 : index
    %163 = vector.load %arg5[%c0_71, %c60] : memref<32x96xbf16, #tpu.memory_space<vmem>>, vector<32x4xbf16>
    %164 = vector.shape_cast %163 : vector<32x4xbf16> to vector<4x8x4xbf16>
    %c0_72 = arith.constant 0 : index
    %c92 = arith.constant 92 : index
    %165 = vector.load %arg5[%c0_72, %c92] : memref<32x96xbf16, #tpu.memory_space<vmem>>, vector<32x4xbf16>
    %166 = vector.shape_cast %165 : vector<32x4xbf16> to vector<4x8x4xbf16>
    "tpu.trace_start"() <{level = 10 : i32, message = "gnd,gmd->gnm"}> : () -> ()
    %cst_73 = arith.constant dense<0.000000e+00> : vector<4x8x8xf32>
    %167 = tpu.matmul %162, %164, %cst_73 {dimension_numbers = #tpu.dot_dimension_numbers<[2], [2], [1], [1], [0, 0, 0, 1, 1, 1], [0], [0]>} : vector<4x8x4xbf16>, vector<4x8x4xbf16>, vector<4x8x8xf32> -> vector<4x8x8xf32>
    "tpu.trace_stop"() : () -> ()
    %cst_74 = arith.constant dense<0xFF800000> : vector<4x8xf32>
    %168 = vector.multi_reduction <maximumf>, %167, %cst_74 [2] : vector<4x8x8xf32> to vector<4x8xf32>
    %169 = vector.shape_cast %168 : vector<4x8xf32> to vector<4x8x1xf32>
    %170 = vector.broadcast %169 : vector<4x8x1xf32> to vector<4x8x8xf32>
    %171 = arith.subf %167, %170 : vector<4x8x8xf32>
    %172 = math.exp %171 : vector<4x8x8xf32>
    %cst_75 = arith.constant dense<0.000000e+00> : vector<4x8xf32>
    %173 = vector.multi_reduction <add>, %172, %cst_75 [2] : vector<4x8x8xf32> to vector<4x8xf32>
    %174 = vector.shape_cast %173 : vector<4x8xf32> to vector<4x8x1xf32>
    %175 = tpu.reciprocal %174 {approx = true} : vector<4x8x1xf32> -> vector<4x8x1xf32>
    %176 = vector.broadcast %175 : vector<4x8x1xf32> to vector<4x8x8xf32>
    %177 = arith.mulf %172, %176 : vector<4x8x8xf32>
    %178 = arith.truncf %177 : vector<4x8x8xf32> to vector<4x8x8xbf16>
    "tpu.trace_start"() <{level = 10 : i32, message = "gnm,gmd->gnd"}> : () -> ()
    %cst_76 = arith.constant dense<0.000000e+00> : vector<4x8x4xf32>
    %179 = tpu.matmul %178, %166, %cst_76 {dimension_numbers = #tpu.dot_dimension_numbers<[2], [1], [1], [2], [0, 0, 0, 1, 1, 2], [0], [0]>} : vector<4x8x8xbf16>, vector<4x8x4xbf16>, vector<4x8x4xf32> -> vector<4x8x4xf32>
    "tpu.trace_stop"() : () -> ()
    %180 = vector.shape_cast %179 : vector<4x8x4xf32> to vector<32x4xf32>
    %181 = arith.truncf %180 : vector<32x4xf32> to vector<32x4xbf16>
    %c0_77 = arith.constant 0 : index
    %c28_78 = arith.constant 28 : index
    %182 = vector.load %arg6[%c0_77, %c28_78] : memref<32x32xbf16, #tpu.memory_space<vmem>>, vector<32x4xbf16>
    tpu.vector_store %arg6[%c0_77, %c28_78], %181 {strides = array<i32>} : memref<32x32xbf16, #tpu.memory_space<vmem>>, vector<32x4xbf16>,
    %c0_79 = arith.constant 0 : index
    %c0_80 = arith.constant 0 : index
    %183 = vector.load %arg6[%c0_79, %c0_80] : memref<32x32xbf16, #tpu.memory_space<vmem>>, vector<32x32xbf16>
    %c0_81 = arith.constant 0 : index
    %c0_82 = arith.constant 0 : index
    %184 = vector.load %arg3[%c0_81, %c0_82] : memref<32x32xbf16, #tpu.memory_space<vmem>>, vector<32x32xbf16>
    %cst_83 = arith.constant dense<0.000000e+00> : vector<32x32xf32>
    %185 = tpu.matmul %183, %184, %cst_83 {dimension_numbers = #tpu.dot_dimension_numbers<[1], [0], [0], [1], [0, 0, 1, 1], [], []>} : vector<32x32xbf16>, vector<32x32xbf16>, vector<32x32xf32> -> vector<32x32xf32>
    %186 = vector.shape_cast %185 : vector<32x32xf32> to vector<4x8x32xf32>
    %c0_84 = arith.constant 0 : index
    %c0_85 = arith.constant 0 : index
    %c0_86 = arith.constant 0 : index
    %187 = vector.load %arg4[%c0_84, %c0_85, %c0_86] : memref<4x8x32xf32, #tpu.memory_space<vmem>>, vector<4x8x32xf32>
    tpu.vector_store %arg4[%c0_84, %c0_85, %c0_86], %186 {strides = array<i32>} : memref<4x8x32xf32, #tpu.memory_space<vmem>>, vector<4x8x32xf32>,
    return
  }
  func.func @transform_0(%arg0: i32) -> (i32, i32, i32) {
    %c0_i32 = arith.constant 0 : i32
    %c0_i32_0 = arith.constant 0 : i32
    %c0_i32_1 = arith.constant 0 : i32
    return %arg0, %c0_i32, %c0_i32_0 : i32, i32, i32
  }
  func.func @transform_1(%arg0: i32) -> (i32, i32) {
    %c0_i32 = arith.constant 0 : i32
    %c0_i32_0 = arith.constant 0 : i32
    %c0_i32_1 = arith.constant 0 : i32
    return %c0_i32, %c0_i32_0 : i32, i32
  }
  func.func @transform_2(%arg0: i32) -> (i32, i32) {
    %c0_i32 = arith.constant 0 : i32
    %c0_i32_0 = arith.constant 0 : i32
    %c0_i32_1 = arith.constant 0 : i32
    return %c0_i32, %c0_i32_0 : i32, i32
  }
  func.func @transform_3(%arg0: i32) -> (i32, i32, i32) {
    %c0_i32 = arith.constant 0 : i32
    %c0_i32_0 = arith.constant 0 : i32
    %c0_i32_1 = arith.constant 0 : i32
    return %arg0, %c0_i32, %c0_i32_0 : i32, i32, i32
  }
}

</mosaic_0001>

<bundles_post_ra>
// kernel: tpu_custom_call.1
= control target key start
LH: loop header
LB: loop body
LE: loop exit
PB: predicated region body
PF: predicated region fallthrough
CT: control target
= control target key end

     0   :  { %8 = vsyncpa [#allocation5], 0  ;;  %s6187_s0 = inlined_call_operand.hbm [shape: f32[8,8,32], index: 0, kind: input, shape index: {}]   ;;  %s6188_s1 = inlined_call_operand.hbm [shape: bf16[32,96], index: 1, kind: input, shape index: {}]   ;;  %s6189_s2 = inlined_call_operand.hbm [shape: bf16[32,32], index: 2, kind: input, shape index: {}]   ;;  %s6190_s3 = inlined_call_operand.hbm [shape: f32[8,8,32], index: 3, kind: output, shape index: {}]  }
   0x1   :  { %10 = vsyncpa [#allocation5 + $0x1], 0 }
   0x2   :  { %11 = vsyncpa [#allocation8], 0 }
   0x3   :  { %12 = vsyncpa [#allocation6], 0 }
   0x4   :  { %14 = vsyncpa [#allocation6 + $0x1], 0  ;;  %s5316_s12 = smov 0   ;;  %s5318_s13 = smov 0  }
   0x5   :  { %s5320_s14 = smov 0   ;;  %s5322_s15 = smov 0  }
   0x6 LB: > { %s5337_s16 = sadd.s32 4294967295, %s5253_s15   ;;  %s4193_s17 = sadd.s32 4294967294, %s5253_s15   ;;  %s5253_s15 = sphi %s5322_s15, %s6210_s15   ;;  %s5249_s14 = sphi %s5320_s14, %s6209_s14   ;;  %s5245_s13 = sphi %s5318_s13, %s6208_s13   ;;  %s5241_s12 = sphi %s5316_s12, %s6207_s12  }
   0x7   : > { %p40_p0 = scmp.ne.s32.totalorder %s5245_s13, %s5241_s12  ;;  %p6191_p1 = scmp.eq.s32.totalorder %s5337_s16, 0 }
   0x8   : > { %p112_p3 = scmp.eq.s32.totalorder %s4193_s17, 1  ;;  %p4194_p5 = scmp.ge.s32.totalorder %s5253_s15, 1 }
   0x9   : > { %p5346_p4 = por %p6191_p1, %p40_p0  ;;  %p119_p7 = scmp.lt.s32.totalorder %s5253_s15, 3 }
   0xa   : > { %p5351_p6 = por %p112_p3, %p40_p0  ;;  %s5255_s21 = smov [#allocation7]  }
   0xb   : > { %s6194_s18 = scalar_select %p5346_p4, 1, 0 }
   0xc   : > { %s6195_s19 = scalar_select %p5351_p6, 1, 0 }
   0xd   : > { %p5356_p8 = pnand %p4194_p5, %p119_p7  ;;  %s131_s22 = sshll.u32 %s5255_s21, 4  ;;  %s5360_s22 = int_to_ptr.vmem [resolvable:$true] %s131_s22 }
   0xe   : > { %s5256_s24 = smov [#allocation9]   ;;  %s5097_s28 = scalar_lea.hbm %s6188_s1, 256 }
   0xf   : > { %p4865_p9 = pneg %p5356_p8  ;;  %s144_s25 = sshll.u32 %s5256_s24, 4  ;;  %s5371_s25 = int_to_ptr.vmem [resolvable:$true] %s144_s25 }
  0x10   : > { %p5098_p12 = scmp.ne.s32.totalorder %s6188_s1, %s5097_s28  ;;  %p5104_p5 = scmp.lt.u32.totalorder %s5097_s28, %s6188_s1 }
  0x11   : > { %p5367_p11 = pnand %p4865_p9, %p6191_p1 }
  0x13   : > { %p5099_p13 = pneg %p5367_p11 }
  0x15   : > { %p5100_p0 = pnand %p5099_p13, %p5098_p12 }
  0x17   : > { %p5101_p3 = pneg %p5100_p0 }
  0x19   : > { %p5106_p7 = pnand %p5104_p5, %p5101_p3 }
  0x1b   : > { %5109 = shalt.err (!%p5106_p7)
}
  0x1c   : > { %s5110_s6 = scalar_lea.vmem %s5360_s22, 256  ;;  %p5118_p2 = scmp.lt.s32.totalorder %s5360_s22, %s5360_s22 }
  0x1d   : > { %p5111_p9 = scmp.ne.s32.totalorder %s5360_s22, %s5110_s6  ;;  %p5119_p12 = scmp.lt.s32.totalorder %s5110_s6, %s5110_s6 }
  0x1f   : > { %p5113_p10 = pnand %p5111_p9, %p5099_p13  ;;  %p5120_p0 = por %p5119_p12, %p5118_p2 }
  0x21   : > { %p5114_p1 = pneg %p5113_p10 }
  0x23   : > { %p5121_p6 = pnand %p5120_p0, %p5114_p1 }
  0x25   : > { %5124 = shalt.err (!%p5121_p6)
}
  0x26   : > { %s5257_s7 = smov 64   ;;  %s5258_s8 = smov 4  }
  0x27   : > { %4868 = dma.hbm_to_vmem [thread:$0]  (!%p5367_p11), %s6188_s1, 256, %s5360_s22, [#allocation8], %s5257_s7, %s5257_s7, %s5258_s8  }
  0x28   : > { %s5125_s21 = scalar_lea.hbm %s6189_s2, 256 }
  0x29   : > { %p5126_p2 = scmp.ne.s32.totalorder %s6189_s2, %s5125_s21  ;;  %p5132_p10 = scmp.lt.u32.totalorder %s5125_s21, %s6189_s2 }
  0x2b   : > { %p5128_p1 = pnand %p5126_p2, %p5099_p13 }
  0x2d   : > { %p5129_p6 = pneg %p5128_p1 }
  0x2f   : > { %p5134_p3 = pnand %p5132_p10, %p5129_p6 }
  0x31   : > { %5137 = shalt.err (!%p5134_p3)
}
  0x32   : > { %s5138_s22 = scalar_lea.vmem %s5371_s25, 256  ;;  %p5146_p12 = scmp.lt.s32.totalorder %s5371_s25, %s5371_s25 }
  0x33   : > { %p5139_p5 = scmp.ne.s32.totalorder %s5371_s25, %s5138_s22  ;;  %p5147_p0 = scmp.lt.s32.totalorder %s5138_s22, %s5138_s22 }
  0x35   : > { %p5141_p7 = pnand %p5139_p5, %p5099_p13  ;;  %p5148_p2 = por %p5147_p0, %p5146_p12 }
  0x37   : > { %p5142_p9 = pneg %p5141_p7 }
  0x39   : > { %p5149_p1 = pnand %p5148_p2, %p5142_p9 }
  0x3b   : > { %5152 = shalt.err (!%p5149_p1)
}
  0x3c   : > { %4871 = dma.hbm_to_vmem [thread:$0]  (!%p5367_p11), %s6189_s2, 256, %s5371_s25, [#allocation8], %s5257_s7, %s5257_s7, %s5258_s8  }
  0x3d   : > { %s5426_s4 = sadd.s32 1, %s5253_s15   ;;  %s27_s23 = sadd.s32 1, %s5249_s14 }
  0x3e   : > { %s24_s5 = ssub.s32 %s5253_s15, %s5426_s4  ;;  %p34_p13 = scmp.ne.s32.totalorder %s5249_s14, %s5245_s13 }
  0x3f   : > { %p25_p6 = scmp.eq.s32.totalorder %s24_s5, 0  ;;  %p35_p10 = scmp.eq.s32.totalorder %s5253_s15, 0 }
  0x40   : > { %p6198_p3 = scmp.eq.s32.totalorder %s5337_s16, 1  ;;  %p4882_p7 = scmp.lt.s32.totalorder %s5253_s15, 2 }
  0x41   : > { %s5442_s9 = scalar_select %p25_p6, %s5249_s14, %s27_s23  }
  0x42   : > { %p5436_p5 = por %p6198_p3, %p34_p13  ;;  %p36_p9 = por %p35_p10, %p34_p13 }
  0x43   : > { %s158_s10 = sand.u32 1, %s5249_s14   ;;  %s4315_s25 = sshll.u32 %s5253_s15, 9 }
  0x44   : > { %s6199_s6 = scalar_select %p5436_p5, 1, 0 }
  0x45   : > { %s4198_s11 = sshll.u32 %s158_s10, 5  ;;  %s5449_s17 = scalar_lea.hbm %s6187_s0, %s4315_s25 }
  0x46   : > { %s162_s21 = scalar_lea.vmem [#allocation4], %s4198_s11  ;;  %p5453_p11 = pnand %p4882_p7, %p36_p9 }
  0x47   : > { %s169_s24 = sshll.u32 %s162_s21, 4  ;;  %s5457_s27 = scalar_lea.sflag [#allocation5], %s158_s10  ;;  %s5451_s24 = int_to_ptr.vmem [resolvable:$true] %s169_s24 }
  0x48   : > { %s5153_s28 = scalar_lea.hbm %s5449_s17, 512  ;;  %p5155_p0 = pneg %p5453_p11 }
  0x49   : > { %p5154_p12 = scmp.ne.s32.totalorder %s5449_s17, %s5153_s28  ;;  %s5158_s30 = scalar_lea.hbm %s6187_s0, 1024 }
  0x4a   : > { %p5159_p13 = scmp.lt.u32.totalorder %s5449_s17, %s6187_s0  ;;  %p5160_p6 = scmp.lt.u32.totalorder %s5158_s30, %s5153_s28 }
  0x4b   : > { %p5156_p2 = pnand %p5155_p0, %p5154_p12  ;;  %p5162_p3 = scmp.lt.u32.totalorder %s5153_s28, %s5449_s17 }
  0x4c   : > { %p5161_p10 = por %p5160_p6, %p5159_p13 }
  0x4d   : > { %p5157_p1 = pneg %p5156_p2 }
  0x4e   : > { %p5163_p7 = por %p5162_p3, %p5161_p10 }
  0x50   : > { %p5164_p9 = pnand %p5163_p7, %p5157_p1 }
  0x52   : > { %5167 = shalt.err (!%p5164_p9)
}
  0x53   : > { %s5168_s10 = scalar_lea.vmem %s5451_s24, 512  ;;  %s5259_s11 = smov [#allocation4]  }
  0x54   : > { %p5169_p12 = scmp.ne.s32.totalorder %s5451_s24, %s5168_s10  ;;  %s5173_s25 = sshll.u32 %s5259_s11, 4  ;;  %s5174_s25 = int_to_ptr.vmem [resolvable:$false] %s5173_s25 }
  0x55   : > { %s5175_s7 = scalar_lea.vmem %s5174_s25, 1024  ;;  %p5176_p4 = scmp.lt.s32.totalorder %s5451_s24, %s5174_s25 }
  0x56   : > { %p5171_p2 = pnand %p5169_p12, %p5155_p0  ;;  %p5177_p13 = scmp.lt.s32.totalorder %s5175_s7, %s5168_s10 }
  0x58   : > { %p5172_p5 = pneg %p5171_p2  ;;  %p5178_p6 = por %p5177_p13, %p5176_p4 }
  0x5a   : > { %p5179_p10 = pnand %p5178_p6, %p5172_p5 }
  0x5c   : > { %5182 = shalt.err (!%p5179_p10)
}
  0x5d   : > { %s5260_s8 = smov 128   ;;  %s5261_s21 = smov 8  }
  0x5e   : > { %4875 = dma.hbm_to_vmem [thread:$0]  (!%p5453_p11), %s5449_s17, 512, %s5451_s24, %s5457_s27, %s5260_s8, %s5260_s8, %s5261_s21  }
  0x5f   : > { %181 = sbr.rel (%p5356_p8) target bundleno = 5725 (0x165d), region = 32  ;;  %s5488_s28 = sand.u32 (!%p5356_p8), 1, %s5245_s13  }
  0x60   : > { %s4202_s22 = sshll.u32 (!%p5356_p8), %s5488_s28, 5  ;;  %s184_s29 = scalar_lea.sflag (!%p5356_p8), [#allocation5], %s5488_s28 }
  0x61   : > { %s187_s30 = scalar_lea.vmem (!%p5356_p8), [#allocation4], %s4202_s22  ;;  %p6201_p4 = scmp.ne.s32.totalorder (!%p5356_p8), %s6194_s18, 0 }
  0x66   : > { %5228 = dma.done.wait (%p6201_p4), %s184_s29, 512  }
  0x67   : > { %5230 = vsyncadd (%p6201_p4), %s184_s29, 4294966784  ;;  %p6202_p5 = scmp.eq.s32.totalorder %s5337_s16, 0 }
  0x69   : > { %5232 = dma.done.wait (%p6202_p5), [#allocation8], 512   ;;  %p6203_p8 = pmov %p6202_p5 }
  0x6a   : > { %v4957_v0 = vld [vmem:[#allocation7] sm:$0xff]   ;;  %v4958_v1 = vld [vmem:[#allocation7 + $0x8] sm:$0xff]   ;;  %vm243_vm0 = vcmask 261120   ;;  %v223_v4 = vld [vmem:[%s187_s30 + $0x10] sm:$0xff]  ;;  %vm301_vm1 = vcmask 785408   ;;  %v5262_v13 = vmov 0.0  }
  0x6b   : > { %5234 = vsyncadd (%p6203_p8), [#allocation8], 4294966784  ;;  %4453 = vmatprep.subr.bf16.mxu0 %v4957_v0  ;;  %v221_v2 = vld [vmem:[%s187_s30] sm:$0xff]  ;;  %v222_v3 = vld [vmem:[%s187_s30 + $0x8] sm:$0xff]  ;;  %4461 = vmatprep.subr.bf16.mxu1 %v5262_v13  ;;  %vm5263_vm2 = vmmov 0   ;;  %s5264_s18 = smov 96  }
  0x6c   : > { %4454 = vmatpush3.bf16.msra.mxu0 %v4957_v0  ;;  %v225_v5 = vpack.c.bf16 %v222_v3, %v221_v2  ;;  %v224_v6 = vld [vmem:[%s187_s30 + $0x18] sm:$0xff]  ;;  %4463 = vmatprep.mubr.msk.bf16.mxu1 %vm5263_vm2, %v5262_v13  ;;  %vm318_vm3 = vcmask 31744   ;;  %vm509_vm4 = vcmask 64512   ;;  %s5265_s20 = smov 64   ;;  %vm563_vm5 = vcmask 1043456   ;;  %s5266_s17 = smov 92  }
  0x6d   : > { %4455 = vmatprep.subr.bf16.mxu0 %v4958_v1  ;;  %v226_v7 = vpack.c.bf16 %v224_v6, %v223_v4  ;;  %s5267_s24 = smov 124   ;;  %s5268_s26 = smov 60   ;;  %vm1217_vm6 = vcmask 64544   ;;  %vm1682_vm7 = vcmask 97344   ;;  %vm2147_vm8 = vcmask 130144  }
  0x6e   : > { %4457 = vmatprep.mubr.msk.bf16.mxu0 %vm243_vm0, %v225_v5  ;;  %s5269_s27 = smov 88   ;;  %s5270_s23 = smov 120   ;;  %vm2612_vm9 = vcmask 162944   ;;  %vm3077_vm10 = vcmask 195744   ;;  %vm3542_vm11 = vcmask 228544   ;;  %vm4007_vm12 = vcmask 261344  }
  0x6f   : > { %s5271_s5 = smov 56   ;;  %s5272_s10 = smov 84  }
  0x70   : > { %4456 = vmatpush3.bf16.msra.mxu0 %v4958_v1  ;;  %s5273_s11 = smov 116   ;;  %s5274_s25 = smov 52  }
  0x71   : > { %4467 = vmatprep.subr.bf16.mxu0 %v5262_v13  ;;  %s5275_s7 = smov 80   ;;  %s5276_s8 = smov 112  }
  0x72   : > { %s5277_s21 = smov 48   ;;  %s5278_s29 = smov 76  }
  0x73   : > { %4458 = vmatmul.mubr.msk.bf16.vlgmr.msra.gmra.mrb[0].mxu0 %vm243_vm0, %v226_v7  ;;  %s5279_s30 = smov 108   ;;  %p6204_p0 = scmp.ne.s32.totalorder %s6199_s6, 0 }
  0x74   : > { %4469 = vmatprep.mubr.msk.bf16.mxu0 %vm5263_vm2, %v5262_v13 }
 0x146   : > { %v4459_v8 = vpop.f32.mrb[0].mxu0 }
 0x147   : > { %v284_v9 = vpop.f32.mrb[1].mxu0 }
 0x148   : > { %v4460_v10 = vpop.f32.mrb[2].mxu0 }
 0x149   : > { %v300_v11 = vpack.c.bf16 %v4460_v10, %v4459_v8  ;;  %v287_v12 = vpop.f32.mrb[3].mxu0 }
 0x14a   : > { %v299_v14 = vpack.c.bf16 %v287_v12, %v284_v9 }
 0x14b   : > { %303 = vst.msk [vmem:[#allocation2 + $0x8] sm:$0xff] %vm301_vm1, %v300_v11 }
 0x14c   : > { %302 = vst.msk [vmem:[#allocation2] sm:$0xff] %vm301_vm1, %v299_v14 }
 0x152   : > { %v305_v15 = vld [vmem:[#allocation2 + $0x8] sm:$0xff] }
 0x153   : > { %v5510_v16 = vcombine.low %v305_v15, %v305_v15  ;;  %v304_v17 = vld [vmem:[#allocation2] sm:$0xff]  ;;  %v5516_v19 = vcombine.high %v305_v15, %v305_v15 }
 0x154   : > { %v5512_v18 = vcombine.low %v304_v17, %v304_v17  ;;  %v5518_v20 = vcombine.high %v304_v17, %v304_v17 }
 0x155   : > { %413 = vrot.lane.b32.xlu1 %v5510_v16, %s5264_s18 }
 0x156   : > { %316 = vrot.lane.b32.xlu0 %v5512_v18, %s5264_s18 }
 0x159   : > { %461 = vrot.lane.b32.xlu1 %v5516_v19, %s5264_s18 }
 0x15a   : > { %365 = vrot.lane.b32.xlu0 %v5518_v20, %s5264_s18  ;;  %s5280_s18 = smov 44  }
 0x1c7   : > { %v414_v23 = vpop.permute.xlu1 %413 }
 0x1c8   : > { %v317_v21 = vpop.permute.xlu0 %316  ;;  %v419_v26 = vsel %vm318_vm3, %v414_v23, 0 }
 0x1c9   : > { %v323_v22 = vsel %vm318_vm3, %v317_v21, 0 }
 0x1ca   : > { %4462 = vmatpush3.bf16.xpose.msra.mxu1 %v323_v22 }
 0x1cb   : > { %4473 = vmatprep.subr.bf16.mxu1 %v5262_v13  ;;  %v462_v27 = vpop.permute.xlu1 %461 }
 0x1cc   : > { %v366_v24 = vpop.permute.xlu0 %365  ;;  %v467_v28 = vsel %vm318_vm3, %v462_v27, 0 }
 0x1cd   : > { %v371_v25 = vsel %vm318_vm3, %v366_v24, 0 }
 0x1ce   : > { %4468 = vmatpush3.bf16.xpose.msra.mxu0 %v371_v25 }
 0x1cf   : > { %4479 = vmatprep.subr.bf16.mxu0 %v5262_v13 }
 0x1d1   : > { %4464 = vmatmul.mubr.msk.bf16.vlgmr.msra.gmra.mrb[0].mxu1 %vm318_vm3, %v5512_v18 }
 0x1d2   : > { %4474 = vmatpush3.bf16.xpose.msra.mxu1 %v419_v26  ;;  %4475 = vmatprep.mubr.msk.bf16.mxu1 %vm5263_vm2, %v5262_v13 }
 0x1d3   : > { %4485 = vmatprep.subr.bf16.mxu1 %v5262_v13 }
 0x1d5   : > { %4470 = vmatmul.mubr.msk.bf16.vlgmr.msra.gmra.mrb[4].mxu0 %vm318_vm3, %v5518_v20 }
 0x1d6   : > { %4480 = vmatpush3.bf16.xpose.msra.mxu0 %v467_v28  ;;  %4481 = vmatprep.mubr.msk.bf16.mxu0 %vm5263_vm2, %v5262_v13 }
 0x1d7   : > { %4491 = vmatprep.subr.bf16.mxu0 %v5262_v13 }
 0x1d9   : > { %4476 = vmatmul.mubr.msk.bf16.vlgmr.msra.gmra.mrb[4].mxu1 %vm318_vm3, %v5510_v16 }
 0x1da   : > { %4487 = vmatprep.mubr.msk.bf16.mxu1 %vm5263_vm2, %v5262_v13 }
 0x1dd   : > { %4482 = vmatmul.mubr.msk.bf16.vlgmr.msra.gmra.mrb[8].mxu0 %vm318_vm3, %v5516_v19 }
 0x1de   : > { %4493 = vmatprep.mubr.msk.bf16.mxu0 %vm5263_vm2, %v5262_v13 }
 0x2a4   : > { %v359_v29 = vpop.f32.mrb[0].mxu1 }
 0x2a5   : > { %v4465_v30 = vpop.f32.mrb[1].mxu1  ;;  %v510_v31 = vsel %vm509_vm4, %v359_v29, -inf }
 0x2a6   : > { %511 = vmax.xlane.f32.xlu0 %v510_v31  ;;  %v362_v32 = vpop.f32.mrb[2].mxu1 }
 0x2a7   : > { %v4466_v33 = vpop.f32.mrb[3].mxu1 }
 0x2a8   : > { %v407_v34 = vpop.f32.mrb[4].mxu0 }
 0x2a9   : > { %v4471_v35 = vpop.f32.mrb[5].mxu0  ;;  %v513_v36 = vsel %vm509_vm4, %v407_v34, -inf }
 0x2aa   : > { %514 = vmax.xlane.f32.xlu1 %v513_v36  ;;  %v410_v37 = vpop.f32.mrb[6].mxu0 }
 0x2ab   : > { %v4472_v38 = vpop.f32.mrb[7].mxu0 }
 0x2ac   : > { %v455_v39 = vpop.f32.mrb[4].mxu1 }
 0x2ad   : > { %v4477_v40 = vpop.f32.mrb[5].mxu1  ;;  %v516_v41 = vsel %vm509_vm4, %v455_v39, -inf }
 0x2ae   : > { %517 = vmax.xlane.f32.xlu0 %v516_v41  ;;  %v458_v42 = vpop.f32.mrb[6].mxu1 }
 0x2af   : > { %v4478_v43 = vpop.f32.mrb[7].mxu1 }
 0x2b0   : > { %v503_v44 = vpop.f32.mrb[8].mxu0 }
 0x2b1   : > { %v4483_v45 = vpop.f32.mrb[9].mxu0  ;;  %v519_v46 = vsel %vm509_vm4, %v503_v44, -inf }
 0x2b2   : > { %520 = vmax.xlane.f32.xlu0 %v519_v46  ;;  %v506_v47 = vpop.f32.mrb[10].mxu0 }
 0x2b3   : > { %v4484_v48 = vpop.f32.mrb[11].mxu0 }
 0x2bb   : > { %558 = vrot.lane.b32.xlu1 %v5512_v18, %s5265_s20 }
 0x333   : > { %v512_v49 = vpop.xlane.xlu0 %511 }
 0x334   : > { %v522_v50 = vsub.f32 %v359_v29, %v512_v49 }
 0x336   : > { %v526_v51 = vmul.f32 1.442695, %v522_v50 }
 0x337   : > { %v515_v52 = vpop.xlane.xlu1 %514 }
 0x338   : > { %4969 = vpow2.f32 %v526_v51  ;;  %v523_v53 = vsub.f32 %v407_v34, %v515_v52 }
 0x33a   : > { %v528_v54 = vmul.f32 1.442695, %v523_v53 }
 0x33b   : > { %v559_v55 = vpop.permute.xlu1 %558  ;;  %v518_v61 = vpop.xlane.xlu0 %517 }
 0x33c   : > { %4971 = vpow2.f32 %v528_v54  ;;  %v565_v56 = vsel %vm563_vm5, %v559_v55, 0  ;;  %v524_v63 = vsub.f32 %v455_v39, %v518_v61 }
 0x33d   : > { %4486 = vmatpush3.bf16.msra.mxu1 %v565_v56 }
 0x33e   : > { %4497 = vmatprep.subr.bf16.mxu1 %v5262_v13  ;;  %v530_v1 = vmul.f32 1.442695, %v524_v63 }
 0x33f   : > { %v521_v62 = vpop.xlane.xlu0 %520 }
 0x340   : > { %v525_v0 = vsub.f32 %v503_v44, %v521_v62  ;;  %4973 = vpow2.f32 %v530_v1 }
 0x342   : > { %v4970_v57 = vpop.eup %4969  ;;  %v532_v2 = vmul.f32 1.442695, %v525_v0 }
 0x343   : > { %v534_v58 = vsel %vm509_vm4, %v4970_v57, 0.0 }
 0x344   : > { %535 = vadd.xlane.f32.xlu1 %v534_v58  ;;  %4975 = vpow2.f32 %v532_v2 }
 0x346   : > { %v4972_v59 = vpop.eup %4971 }
 0x347   : > { %v537_v60 = vsel %vm509_vm4, %v4972_v59, 0.0 }
 0x348   : > { %538 = vadd.xlane.f32.xlu0 %v537_v60 }
 0x34a   : > { %v4974_v3 = vpop.eup %4973 }
 0x34b   : > { %v540_v5 = vsel %vm509_vm4, %v4974_v3, 0.0 }
 0x34e   : > { %v4976_v4 = vpop.eup %4975 }
 0x34f   : > { %v543_v6 = vsel %vm509_vm4, %v4976_v4, 0.0 }
 0x355   : > { %655 = vrot.lane.b32.xlu1 %v5510_v16, %s5265_s20 }
 0x359   : > { %703 = vrot.lane.b32.xlu1 %v5516_v19, %s5265_s20 }
 0x35e   : > { %607 = vrot.lane.b32.xlu0 %v5518_v20, %s5265_s20  ;;  %s5281_s20 = smov 72  }
 0x37d   : > { %541 = vadd.xlane.f32.xlu1 %v540_v5  ;;  %544 = vadd.xlane.f32.xlu0 %v543_v6 }
 0x38e   : > { %817 = vrot.lane.b32.xlu1 %v5518_v20, %s5266_s17 }
 0x392   : > { %815 = vrot.lane.b32.xlu1 %v5518_v20, %s5267_s24 }
 0x393   : > { %766 = vrot.lane.b32.xlu0 %v5512_v18, %s5266_s17 }
 0x396   : > { %919 = vrot.lane.b32.xlu1 %v5516_v19, %s5266_s17 }
 0x397   : > { %764 = vrot.lane.b32.xlu0 %v5512_v18, %s5267_s24 }
 0x39a   : > { %917 = vrot.lane.b32.xlu1 %v5516_v19, %s5267_s24 }
 0x39b   : > { %868 = vrot.lane.b32.xlu0 %v5510_v16, %s5266_s17  ;;  %s5282_s17 = smov 104  }
 0x39f   : > { %866 = vrot.lane.b32.xlu0 %v5510_v16, %s5267_s24  ;;  %s5283_s24 = smov 40  }
 0x3d1   : > { %v536_v7 = vpop.xlane.xlu1 %535 }
 0x3d2   : > { %4977 = vrcp.f32 %v536_v7 }
 0x3d5   : > { %v539_v8 = vpop.xlane.xlu0 %538  ;;  %v656_v12 = vpop.permute.xlu1 %655 }
 0x3d6   : > { %4979 = vrcp.f32 %v539_v8  ;;  %v661_v21 = vsel %vm563_vm5, %v656_v12, 0 }
 0x3d9   : > { %v608_v9 = vpop.permute.xlu0 %607  ;;  %v704_v23 = vpop.permute.xlu1 %703 }
 0x3da   : > { %v613_v10 = vsel %vm563_vm5, %v608_v9, 0  ;;  %v709_v25 = vsel %vm563_vm5, %v704_v23, 0 }
 0x3db   : > { %4492 = vmatpush3.bf16.msra.mxu0 %v613_v10 }
 0x3dc   : > { %v4978_v11 = vpop.eup %4977  ;;  %4503 = vmatprep.subr.bf16.mxu0 %v5262_v13 }
 0x3dd   : > { %v550_v14 = vmul.f32 %v4978_v11, %v4970_v57 }
 0x3df   : > { %v554_v15 = vpack.c.bf16 %v550_v14, %v550_v14 }
 0x3e0   : > { %v4980_v17 = vpop.eup %4979 }
 0x3e1   : > { %4488 = vmatmul.mubr.msk.bf16.vlgmr.msra.gmra.mrb[8].mxu1 %vm509_vm4, %v554_v15  ;;  %v551_v22 = vmul.f32 %v4980_v17, %v4972_v59 }
 0x3e2   : > { %4498 = vmatpush3.bf16.msra.mxu1 %v661_v21  ;;  %4499 = vmatprep.mubr.msk.bf16.mxu1 %vm5263_vm2, %v5262_v13 }
 0x3e3   : > { %v555_v24 = vpack.c.bf16 %v551_v22, %v551_v22  ;;  %4509 = vmatprep.subr.bf16.mxu1 %v5262_v13 }
 0x3e5   : > { %4494 = vmatmul.mubr.msk.bf16.vlgmr.msra.gmra.mrb[12].mxu0 %vm509_vm4, %v555_v24 }
 0x3e6   : > { %4504 = vmatpush3.bf16.msra.mxu0 %v709_v25  ;;  %4505 = vmatprep.mubr.msk.bf16.mxu0 %vm5263_vm2, %v5262_v13 }
 0x3e7   : > { %4515 = vmatprep.subr.bf16.mxu0 %v5262_v13 }
 0x40a   : > { %v542_v26 = vpop.xlane.xlu1 %541  ;;  %v545_v27 = vpop.xlane.xlu0 %544 }
 0x40b   : > { %4981 = vrcp.f32 %v542_v26 }
 0x40c   : > { %4983 = vrcp.f32 %v545_v27 }
 0x40e   : > { %v767_v28 = vpop.permute.xlu0 %766  ;;  %v818_v29 = vpop.permute.xlu1 %817 }
 0x40f   : > { %v772_v37 = vsel %vm318_vm3, %v767_v28, 0  ;;  %v823_v39 = vsel %vm318_vm3, %v818_v29, 0 }
 0x412   : > { %v765_v35 = vpop.permute.xlu0 %764  ;;  %v816_v38 = vpop.permute.xlu1 %815 }
 0x415   : > { %v4982_v30 = vpop.eup %4981 }
 0x416   : > { %v4984_v31 = vpop.eup %4983  ;;  %v552_v32 = vmul.f32 %v4982_v30, %v4974_v3  ;;  %v869_v40 = vpop.permute.xlu0 %868 }
 0x417   : > { %v553_v33 = vmul.f32 %v4984_v31, %v4976_v4  ;;  %v920_v41 = vpop.permute.xlu1 %919  ;;  %v874_v42 = vsel %vm318_vm3, %v869_v40, 0 }
 0x418   : > { %v556_v34 = vpack.c.bf16 %v552_v32, %v552_v32  ;;  %v925_v43 = vsel %vm318_vm3, %v920_v41, 0 }
 0x419   : > { %v557_v36 = vpack.c.bf16 %v553_v33, %v553_v33 }
 0x41a   : > { %4500 = vmatmul.mubr.msk.bf16.vlgmr.msra.gmra.mrb[12].mxu1 %vm509_vm4, %v556_v34  ;;  %v867_v44 = vpop.permute.xlu0 %866 }
 0x41b   : > { %4506 = vmatmul.mubr.msk.bf16.vlgmr.msra.gmra.mrb[16].mxu0 %vm509_vm4, %v557_v36  ;;  %4510 = vmatpush3.bf16.xpose.msra.mxu1 %v772_v37  ;;  %v918_v45 = vpop.permute.xlu1 %917 }
 0x41c   : > { %4516 = vmatpush3.bf16.xpose.msra.mxu0 %v823_v39  ;;  %4511 = vmatprep.mubr.msk.bf16.mxu1 %vm5263_vm2, %v5262_v13 }
 0x41d   : > { %4517 = vmatprep.mubr.msk.bf16.mxu0 %vm5263_vm2, %v5262_v13  ;;  %4521 = vmatprep.subr.bf16.mxu1 %v5262_v13 }
 0x41e   : > { %4527 = vmatprep.subr.bf16.mxu0 %v5262_v13 }
 0x422   : > { %4512 = vmatmul.mubr.msk.bf16.vlgmr.msra.gmra.mrb[16].mxu1 %vm318_vm3, %v765_v35 }
 0x423   : > { %4518 = vmatmul.mubr.msk.bf16.vlgmr.msra.gmra.mrb[20].mxu0 %vm318_vm3, %v816_v38  ;;  %4522 = vmatpush3.bf16.xpose.msra.mxu1 %v874_v42 }
 0x424   : > { %4528 = vmatpush3.bf16.xpose.msra.mxu0 %v925_v43  ;;  %4523 = vmatprep.mubr.msk.bf16.mxu1 %vm5263_vm2, %v5262_v13 }
 0x425   : > { %4529 = vmatprep.mubr.msk.bf16.mxu0 %vm5263_vm2, %v5262_v13  ;;  %4533 = vmatprep.subr.bf16.mxu1 %v5262_v13 }
 0x426   : > { %4539 = vmatprep.subr.bf16.mxu0 %v5262_v13 }
 0x42a   : > { %4524 = vmatmul.mubr.msk.bf16.vlgmr.msra.gmra.mrb[20].mxu1 %vm318_vm3, %v867_v44 }
 0x42b   : > { %4530 = vmatmul.mubr.msk.bf16.vlgmr.msra.gmra.mrb[24].mxu0 %vm318_vm3, %v918_v45  ;;  %4535 = vmatprep.mubr.msk.bf16.mxu1 %vm5263_vm2, %v5262_v13 }
 0x42c   : > { %4541 = vmatprep.mubr.msk.bf16.mxu0 %vm5263_vm2, %v5262_v13 }
 0x4b4   : > { %v601_v46 = vpop.f32.mrb[8].mxu1 }
 0x4b5   : > { %v4489_v47 = vpop.f32.mrb[9].mxu1 }
 0x4b6   : > { %v604_v48 = vpop.f32.mrb[10].mxu1 }
 0x4b7   : > { %v4490_v49 = vpop.f32.mrb[11].mxu1 }
 0x4b8   : > { %v649_v50 = vpop.f32.mrb[12].mxu0 }
 0x4b9   : > { %v751_v51 = vpack.c.bf16 %v649_v50, %v601_v46  ;;  %v4495_v52 = vpop.f32.mrb[13].mxu0 }
 0x4ba   : > { %v652_v53 = vpop.f32.mrb[14].mxu0 }
 0x4bb   : > { %753 = vst.msk [vmem:[#allocation3] sm:$0xff] %vm318_vm3, %v751_v51  ;;  %v4496_v54 = vpop.f32.mrb[15].mxu0 }
 0x4ed   : > { %v697_v55 = vpop.f32.mrb[12].mxu1 }
 0x4ee   : > { %v745_v56 = vpop.f32.mrb[16].mxu0  ;;  %v4501_v57 = vpop.f32.mrb[13].mxu1 }
 0x4ef   : > { %v752_v58 = vpack.c.bf16 %v745_v56, %v697_v55  ;;  %v4507_v59 = vpop.f32.mrb[17].mxu0  ;;  %v700_v60 = vpop.f32.mrb[14].mxu1 }
 0x4f0   : > { %v748_v61 = vpop.f32.mrb[18].mxu0  ;;  %v4502_v62 = vpop.f32.mrb[15].mxu1 }
 0x4f1   : > { %754 = vst.msk [vmem:[#allocation3 + $0x8] sm:$0xff] %vm318_vm3, %v752_v58  ;;  %v4508_v63 = vpop.f32.mrb[19].mxu0 }
 0x4f5   : > { %v808_v0 = vpop.f32.mrb[16].mxu1 }
 0x4f6   : > { %v859_v1 = vpop.f32.mrb[20].mxu0  ;;  %v4513_v2 = vpop.f32.mrb[17].mxu1  ;;  %v967_v3 = vsel %vm509_vm4, %v808_v0, -inf }
 0x4f7   : > { %v4519_v4 = vpop.f32.mrb[21].mxu0  ;;  %v970_v5 = vsel %vm509_vm4, %v859_v1, -inf  ;;  %968 = vmax.xlane.f32.xlu0 %v967_v3  ;;  %v811_v6 = vpop.f32.mrb[18].mxu1 }
 0x4f8   : > { %971 = vmax.xlane.f32.xlu1 %v970_v5  ;;  %v862_v7 = vpop.f32.mrb[22].mxu0  ;;  %v4514_v8 = vpop.f32.mrb[19].mxu1 }
 0x4f9   : > { %v4520_v9 = vpop.f32.mrb[23].mxu0 }
 0x4fd   : > { %v910_v10 = vpop.f32.mrb[20].mxu1 }
 0x4fe   : > { %v961_v11 = vpop.f32.mrb[24].mxu0  ;;  %v4525_v12 = vpop.f32.mrb[21].mxu1  ;;  %v973_v14 = vsel %vm509_vm4, %v910_v10, -inf }
 0x4ff   : > { %v4531_v15 = vpop.f32.mrb[25].mxu0  ;;  %974 = vmax.xlane.f32.xlu0 %v973_v14  ;;  %v913_v17 = vpop.f32.mrb[22].mxu1  ;;  %v976_v24 = vsel %vm509_vm4, %v961_v11, -inf }
 0x500   : > { %v964_v21 = vpop.f32.mrb[26].mxu0  ;;  %v4526_v22 = vpop.f32.mrb[23].mxu1 }
 0x501   : > { %v4532_v23 = vpop.f32.mrb[27].mxu0 }
 0x503   : > { %977 = vmax.xlane.f32.xlu0 %v976_v24 }
 0x509   : > { %1015 = vrot.lane.b32.xlu1 %v5512_v18, %s5268_s26 }
 0x584   : > { %v969_v25 = vpop.xlane.xlu0 %968 }
 0x585   : > { %v972_v26 = vpop.xlane.xlu1 %971  ;;  %v979_v27 = vsub.f32 %v808_v0, %v969_v25 }
 0x586   : > { %v980_v28 = vsub.f32 %v859_v1, %v972_v26 }
 0x587   : > { %v983_v29 = vmul.f32 1.442695, %v979_v27 }
 0x588   : > { %v985_v30 = vmul.f32 1.442695, %v980_v28 }
 0x589   : > { %4985 = vpow2.f32 %v983_v29  ;;  %v1016_v31 = vpop.permute.xlu1 %1015 }
 0x58a   : > { %4987 = vpow2.f32 %v985_v30  ;;  %v1021_v32 = vsel %vm563_vm5, %v1016_v31, 0 }
 0x58b   : > { %4534 = vmatpush3.bf16.msra.mxu1 %v1021_v32 }
 0x58c   : > { %4545 = vmatprep.subr.bf16.mxu1 %v5262_v13  ;;  %v975_v37 = vpop.xlane.xlu0 %974 }
 0x58d   : > { %v981_v40 = vsub.f32 %v910_v10, %v975_v37 }
 0x58f   : > { %v987_v42 = vmul.f32 1.442695, %v981_v40 }
 0x590   : > { %v978_v38 = vpop.xlane.xlu0 %977 }
 0x591   : > { %v982_v39 = vsub.f32 %v961_v11, %v978_v38 }
 0x593   : > { %v4986_v33 = vpop.eup %4985  ;;  %v989_v41 = vmul.f32 1.442695, %v982_v39 }
 0x594   : > { %v4988_v34 = vpop.eup %4987  ;;  %v991_v35 = vsel %vm509_vm4, %v4986_v33, 0.0 }
 0x595   : > { %v994_v36 = vsel %vm509_vm4, %v4988_v34, 0.0  ;;  %992 = vadd.xlane.f32.xlu1 %v991_v35  ;;  %4989 = vpow2.f32 %v989_v41 }
 0x596   : > { %995 = vadd.xlane.f32.xlu0 %v994_v36  ;;  %4991 = vpow2.f32 %v987_v42 }
 0x59f   : > { %v4990_v43 = vpop.eup %4989 }
 0x5a0   : > { %v4992_v44 = vpop.eup %4991  ;;  %v1000_v45 = vsel %vm509_vm4, %v4990_v43, 0.0 }
 0x5a1   : > { %v997_v46 = vsel %vm509_vm4, %v4992_v44, 0.0 }
 0x5a6   : > { %1111 = vrot.lane.b32.xlu1 %v5510_v16, %s5268_s26 }
 0x5aa   : > { %1159 = vrot.lane.b32.xlu1 %v5516_v19, %s5268_s26 }
 0x5ac   : > { %1063 = vrot.lane.b32.xlu0 %v5518_v20, %s5268_s26  ;;  %s5284_s26 = smov 68  }
 0x5cb   : > { %1001 = vadd.xlane.f32.xlu0 %v1000_v45 }
 0x5ce   : > { %998 = vadd.xlane.f32.xlu1 %v997_v46 }
 0x5df   : > { %1282 = vrot.lane.b32.xlu1 %v5518_v20, %s5269_s27 }
 0x5e1   : > { %1231 = vrot.lane.b32.xlu0 %v5512_v18, %s5269_s27 }
 0x5e3   : > { %1280 = vrot.lane.b32.xlu1 %v5518_v20, %s5270_s23 }
 0x5e5   : > { %1229 = vrot.lane.b32.xlu0 %v5512_v18, %s5270_s23 }
 0x5e7   : > { %1384 = vrot.lane.b32.xlu1 %v5516_v19, %s5269_s27 }
 0x5e9   : > { %1333 = vrot.lane.b32.xlu0 %v5510_v16, %s5269_s27  ;;  %s5285_s27 = smov 100  }
 0x5eb   : > { %1382 = vrot.lane.b32.xlu1 %v5516_v19, %s5270_s23 }
 0x5ed   : > { %1331 = vrot.lane.b32.xlu0 %v5510_v16, %s5270_s23  ;;  %s5286_s23 = smov 36  }
 0x622   : > { %v993_v47 = vpop.xlane.xlu1 %992 }
 0x623   : > { %4993 = vrcp.f32 %v993_v47  ;;  %v996_v48 = vpop.xlane.xlu0 %995 }
 0x624   : > { %4995 = vrcp.f32 %v996_v48 }
 0x626   : > { %v1112_v51 = vpop.permute.xlu1 %1111 }
 0x627   : > { %v1064_v49 = vpop.permute.xlu0 %1063  ;;  %v1117_v59 = vsel %vm563_vm5, %v1112_v51, 0 }
 0x628   : > { %v1069_v50 = vsel %vm563_vm5, %v1064_v49, 0 }
 0x629   : > { %4540 = vmatpush3.bf16.msra.mxu0 %v1069_v50 }
 0x62a   : > { %4551 = vmatprep.subr.bf16.mxu0 %v5262_v13  ;;  %v1160_v56 = vpop.permute.xlu1 %1159 }
 0x62b   : > { %v1165_v60 = vsel %vm563_vm5, %v1160_v56, 0 }
 0x62d   : > { %v4994_v52 = vpop.eup %4993 }
 0x62e   : > { %v4996_v53 = vpop.eup %4995  ;;  %v1007_v54 = vmul.f32 %v4994_v52, %v4986_v33 }
 0x62f   : > { %v1008_v55 = vmul.f32 %v4996_v53, %v4988_v34 }
 0x630   : > { %v1011_v57 = vpack.c.bf16 %v1007_v54, %v1007_v54 }
 0x631   : > { %v1012_v58 = vpack.c.bf16 %v1008_v55, %v1008_v55 }
 0x632   : > { %4536 = vmatmul.mubr.msk.bf16.vlgmr.msra.gmra.mrb[24].mxu1 %vm509_vm4, %v1011_v57 }
 0x633   : > { %4542 = vmatmul.mubr.msk.bf16.vlgmr.msra.gmra.mrb[28].mxu0 %vm509_vm4, %v1012_v58  ;;  %4546 = vmatpush3.bf16.msra.mxu1 %v1117_v59 }
 0x634   : > { %4552 = vmatpush3.bf16.msra.mxu0 %v1165_v60  ;;  %4553 = vmatprep.mubr.msk.bf16.mxu0 %vm5263_vm2, %v5262_v13 }
 0x635   : > { %4563 = vmatprep.subr.bf16.mxu0 %v5262_v13  ;;  %4547 = vmatprep.mubr.msk.bf16.mxu1 %vm5263_vm2, %v5262_v13 }
 0x636   : > { %4557 = vmatprep.subr.bf16.mxu1 %v5262_v13 }
 0x658   : > { %v1002_v61 = vpop.xlane.xlu0 %1001 }
 0x659   : > { %4997 = vrcp.f32 %v1002_v61 }
 0x65b   : > { %v999_v62 = vpop.xlane.xlu1 %998 }
 0x65c   : > { %4999 = vrcp.f32 %v999_v62  ;;  %v1232_v1 = vpop.permute.xlu0 %1231 }
 0x65d   : > { %v1237_v10 = vsel %vm318_vm3, %v1232_v1, 0 }
 0x65f   : > { %v1283_v63 = vpop.permute.xlu1 %1282 }
 0x660   : > { %v1288_v7 = vsel %vm318_vm3, %v1283_v63, 0  ;;  %v1230_v9 = vpop.permute.xlu0 %1229 }
 0x663   : > { %v4998_v0 = vpop.eup %4997  ;;  %v1281_v5 = vpop.permute.xlu1 %1280 }
 0x664   : > { %v1010_v2 = vmul.f32 %v4998_v0, %v4990_v43  ;;  %v1334_v12 = vpop.permute.xlu0 %1333 }
 0x665   : > { %v1339_v15 = vsel %vm318_vm3, %v1334_v12, 0 }
 0x666   : > { %v5000_v3 = vpop.eup %4999  ;;  %v1014_v4 = vpack.c.bf16 %v1010_v2, %v1010_v2 }
 0x667   : > { %v1009_v6 = vmul.f32 %v5000_v3, %v4992_v44  ;;  %v1385_v11 = vpop.permute.xlu1 %1384 }
 0x668   : > { %4554 = vmatmul.mubr.msk.bf16.vlgmr.msra.gmra.mrb[32].mxu0 %vm509_vm4, %v1014_v4  ;;  %v1390_v14 = vsel %vm318_vm3, %v1385_v11, 0  ;;  %v1332_v21 = vpop.permute.xlu0 %1331 }
 0x669   : > { %4564 = vmatpush3.bf16.xpose.msra.mxu0 %v1288_v7  ;;  %v1013_v8 = vpack.c.bf16 %v1009_v6, %v1009_v6  ;;  %4565 = vmatprep.mubr.msk.bf16.mxu0 %vm5263_vm2, %v5262_v13 }
 0x66a   : > { %4575 = vmatprep.subr.bf16.mxu0 %v5262_v13 }
 0x66b   : > { %4548 = vmatmul.mubr.msk.bf16.vlgmr.msra.gmra.mrb[28].mxu1 %vm509_vm4, %v1013_v8  ;;  %v1383_v17 = vpop.permute.xlu1 %1382 }
 0x66c   : > { %4558 = vmatpush3.bf16.xpose.msra.mxu1 %v1237_v10  ;;  %4559 = vmatprep.mubr.msk.bf16.mxu1 %vm5263_vm2, %v5262_v13 }
 0x66d   : > { %4569 = vmatprep.subr.bf16.mxu1 %v5262_v13 }
 0x670   : > { %4566 = vmatmul.mubr.msk.bf16.vlgmr.msra.gmra.mrb[36].mxu0 %vm318_vm3, %v1281_v5 }
 0x671   : > { %4576 = vmatpush3.bf16.xpose.msra.mxu0 %v1390_v14  ;;  %4577 = vmatprep.mubr.msk.bf16.mxu0 %vm5263_vm2, %v5262_v13 }
 0x672   : > { %4587 = vmatprep.subr.bf16.mxu0 %v5262_v13 }
 0x673   : > { %4560 = vmatmul.mubr.msk.bf16.vlgmr.msra.gmra.mrb[32].mxu1 %vm318_vm3, %v1230_v9 }
 0x674   : > { %4570 = vmatpush3.bf16.xpose.msra.mxu1 %v1339_v15  ;;  %4571 = vmatprep.mubr.msk.bf16.mxu1 %vm5263_vm2, %v5262_v13 }
 0x675   : > { %4581 = vmatprep.subr.bf16.mxu1 %v5262_v13 }
 0x678   : > { %4578 = vmatmul.mubr.msk.bf16.vlgmr.msra.gmra.mrb[40].mxu0 %vm318_vm3, %v1383_v17 }
 0x679   : > { %4589 = vmatprep.mubr.msk.bf16.mxu0 %vm5263_vm2, %v5262_v13 }
 0x67b   : > { %4572 = vmatmul.mubr.msk.bf16.vlgmr.msra.gmra.mrb[36].mxu1 %vm318_vm3, %v1332_v21 }
 0x67c   : > { %4583 = vmatprep.mubr.msk.bf16.mxu1 %vm5263_vm2, %v5262_v13 }
 0x705   : > { %v5668_v22 = vpop.f32.mrb[24].mxu1 }
 0x706   : > { %v5670_v23 = vpop.f32.mrb[28].mxu0  ;;  %v4537_v24 = vpop.f32.mrb[25].mxu1 }
 0x707   : > { %v1207_v25 = vpack.c.bf16 %v5670_v23, %v5668_v22  ;;  %v4543_v26 = vpop.f32.mrb[29].mxu0  ;;  %v1060_v27 = vpop.f32.mrb[26].mxu1 }
 0x708   : > { %v1108_v28 = vpop.f32.mrb[30].mxu0  ;;  %v4538_v29 = vpop.f32.mrb[27].mxu1 }
 0x709   : > { %v4544_v30 = vpop.f32.mrb[31].mxu0 }
 0x73b   : > { %v5674_v31 = vpop.f32.mrb[32].mxu0 }
 0x73c   : > { %v4555_v32 = vpop.f32.mrb[33].mxu0 }
 0x73d   : > { %v1204_v33 = vpop.f32.mrb[34].mxu0 }
 0x73e   : > { %v4556_v34 = vpop.f32.mrb[35].mxu0  ;;  %v5676_v35 = vpop.f32.mrb[28].mxu1 }
 0x73f   : > { %v1208_v36 = vpack.c.bf16 %v5674_v31, %v5676_v35  ;;  %v4549_v37 = vpop.f32.mrb[29].mxu1 }
 0x740   : > { %v1156_v38 = vpop.f32.mrb[30].mxu1 }
 0x741   : > { %v4550_v39 = vpop.f32.mrb[31].mxu1 }
 0x743   : > { %v1324_v40 = vpop.f32.mrb[36].mxu0 }
 0x744   : > { %v4567_v41 = vpop.f32.mrb[37].mxu0  ;;  %v1435_v42 = vsel %vm509_vm4, %v1324_v40, -inf }
 0x745   : > { %1436 = vmax.xlane.f32.xlu1 %v1435_v42  ;;  %v1327_v43 = vpop.f32.mrb[38].mxu0 }
 0x746   : > { %v4568_v44 = vpop.f32.mrb[39].mxu0  ;;  %v1273_v45 = vpop.f32.mrb[32].mxu1 }
 0x747   : > { %v4561_v46 = vpop.f32.mrb[33].mxu1  ;;  %v1432_v47 = vsel %vm509_vm4, %v1273_v45, -inf }
 0x748   : > { %1433 = vmax.xlane.f32.xlu0 %v1432_v47  ;;  %v1276_v48 = vpop.f32.mrb[34].mxu1 }
 0x749   : > { %v4562_v49 = vpop.f32.mrb[35].mxu1 }
 0x74b   : > { %v1426_v50 = vpop.f32.mrb[40].mxu0 }
 0x74c   : > { %v4579_v51 = vpop.f32.mrb[41].mxu0  ;;  %v1441_v59 = vsel %vm509_vm4, %v1426_v50, -inf }
 0x74d   : > { %v1429_v52 = vpop.f32.mrb[42].mxu0 }
 0x74e   : > { %v4580_v53 = vpop.f32.mrb[43].mxu0  ;;  %v1375_v54 = vpop.f32.mrb[36].mxu1 }
 0x74f   : > { %v4573_v55 = vpop.f32.mrb[37].mxu1  ;;  %v1438_v56 = vsel %vm509_vm4, %v1375_v54, -inf }
 0x750   : > { %1439 = vmax.xlane.f32.xlu0 %v1438_v56  ;;  %v1378_v57 = vpop.f32.mrb[38].mxu1 }
 0x751   : > { %v4574_v58 = vpop.f32.mrb[39].mxu1 }
 0x754   : > { %1442 = vmax.xlane.f32.xlu0 %v1441_v59 }
 0x756   : > { %1480 = vrot.lane.b32.xlu1 %v5512_v18, %s5271_s5 }
 0x7d2   : > { %v1437_v60 = vpop.xlane.xlu1 %1436 }
 0x7d3   : > { %v1445_v61 = vsub.f32 %v1324_v40, %v1437_v60 }
 0x7d5   : > { %v1450_v62 = vmul.f32 1.442695, %v1445_v61  ;;  %v1434_v63 = vpop.xlane.xlu0 %1433 }
 0x7d6   : > { %v1481_v0 = vpop.permute.xlu1 %1480  ;;  %v1444_v1 = vsub.f32 %v1273_v45, %v1434_v63 }
 0x7d7   : > { %5001 = vpow2.f32 %v1450_v62  ;;  %v1486_v2 = vsel %vm563_vm5, %v1481_v0, 0 }
 0x7d8   : > { %v1448_v3 = vmul.f32 1.442695, %v1444_v1  ;;  %4582 = vmatpush3.bf16.msra.mxu1 %v1486_v2 }
 0x7d9   : > { %4593 = vmatprep.subr.bf16.mxu1 %v5262_v13 }
 0x7da   : > { %5003 = vpow2.f32 %v1448_v3 }
 0x7dd   : > { %v1440_v8 = vpop.xlane.xlu0 %1439 }
 0x7de   : > { %v1446_v12 = vsub.f32 %v1375_v54, %v1440_v8 }
 0x7e0   : > { %v1452_v14 = vmul.f32 1.442695, %v1446_v12 }
 0x7e1   : > { %v5002_v4 = vpop.eup %5001  ;;  %v1443_v9 = vpop.xlane.xlu0 %1442 }
 0x7e2   : > { %v1459_v5 = vsel %vm509_vm4, %v5002_v4, 0.0  ;;  %v1447_v10 = vsub.f32 %v1426_v50, %v1443_v9 }
 0x7e3   : > { %1460 = vadd.xlane.f32.xlu0 %v1459_v5 }
 0x7e4   : > { %v5004_v6 = vpop.eup %5003  ;;  %v1454_v11 = vmul.f32 1.442695, %v1447_v10 }
 0x7e5   : > { %v1456_v7 = vsel %vm509_vm4, %v5004_v6, 0.0 }
 0x7e6   : > { %1457 = vadd.xlane.f32.xlu1 %v1456_v7  ;;  %5005 = vpow2.f32 %v1454_v11 }
 0x7e7   : > { %5007 = vpow2.f32 %v1452_v14 }
 0x7f0   : > { %v5006_v15 = vpop.eup %5005 }
 0x7f1   : > { %v1465_v17 = vsel %vm509_vm4, %v5006_v15, 0.0  ;;  %v5008_v21 = vpop.eup %5007 }
 0x7f2   : > { %v1462_v24 = vsel %vm509_vm4, %v5008_v21, 0.0 }
 0x7f7   : > { %1576 = vrot.lane.b32.xlu1 %v5510_v16, %s5271_s5 }
 0x7f9   : > { %1528 = vrot.lane.b32.xlu0 %v5518_v20, %s5271_s5 }
 0x7fb   : > { %1624 = vrot.lane.b32.xlu1 %v5516_v19, %s5271_s5  ;;  %s5287_s5 = smov 4  }
 0x818   : > { %1466 = vadd.xlane.f32.xlu0 %v1465_v17 }
 0x81f   : > { %1463 = vadd.xlane.f32.xlu1 %v1462_v24 }
 0x82e   : > { %1696 = vrot.lane.b32.xlu0 %v5512_v18, %s5272_s10 }
 0x830   : > { %1747 = vrot.lane.b32.xlu1 %v5518_v20, %s5272_s10 }
 0x832   : > { %1694 = vrot.lane.b32.xlu0 %v5512_v18, %s5273_s11 }
 0x834   : > { %1745 = vrot.lane.b32.xlu1 %v5518_v20, %s5273_s11 }
 0x836   : > { %1798 = vrot.lane.b32.xlu0 %v5510_v16, %s5272_s10 }
 0x838   : > { %1849 = vrot.lane.b32.xlu1 %v5516_v19, %s5272_s10  ;;  %s5288_s10 = smov 8  }
 0x83a   : > { %1796 = vrot.lane.b32.xlu0 %v5510_v16, %s5273_s11 }
 0x83c   : > { %1847 = vrot.lane.b32.xlu1 %v5516_v19, %s5273_s11  ;;  %s5289_s11 = smov 12  }
 0x870   : > { %v1461_v26 = vpop.xlane.xlu0 %1460 }
 0x871   : > { %5009 = vrcp.f32 %v1461_v26 }
 0x873   : > { %v1458_v27 = vpop.xlane.xlu1 %1457 }
 0x874   : > { %5011 = vrcp.f32 %v1458_v27  ;;  %v1529_v28 = vpop.permute.xlu0 %1528 }
 0x875   : > { %v1534_v29 = vsel %vm563_vm5, %v1529_v28, 0 }
 0x876   : > { %4588 = vmatpush3.bf16.msra.mxu0 %v1534_v29 }
 0x877   : > { %v1577_v30 = vpop.permute.xlu1 %1576  ;;  %4599 = vmatprep.subr.bf16.mxu0 %v5262_v13 }
 0x878   : > { %v1582_v42 = vsel %vm563_vm5, %v1577_v30, 0 }
 0x87b   : > { %v5010_v32 = vpop.eup %5009  ;;  %v1625_v34 = vpop.permute.xlu1 %1624 }
 0x87c   : > { %v1473_v33 = vmul.f32 %v5010_v32, %v5002_v4  ;;  %v1630_v40 = vsel %vm563_vm5, %v1625_v34, 0 }
 0x87e   : > { %v5012_v37 = vpop.eup %5011  ;;  %v1477_v38 = vpack.c.bf16 %v1473_v33, %v1473_v33 }
 0x87f   : > { %v1472_v39 = vmul.f32 %v5012_v37, %v5004_v6 }
 0x880   : > { %4590 = vmatmul.mubr.msk.bf16.vlgmr.msra.gmra.mrb[44].mxu0 %vm509_vm4, %v1477_v38 }
 0x881   : > { %4600 = vmatpush3.bf16.msra.mxu0 %v1630_v40  ;;  %v1476_v41 = vpack.c.bf16 %v1472_v39, %v1472_v39  ;;  %4601 = vmatprep.mubr.msk.bf16.mxu0 %vm5263_vm2, %v5262_v13 }
 0x882   : > { %4611 = vmatprep.subr.bf16.mxu0 %v5262_v13 }
 0x883   : > { %4584 = vmatmul.mubr.msk.bf16.vlgmr.msra.gmra.mrb[40].mxu1 %vm509_vm4, %v1476_v41 }
 0x884   : > { %4594 = vmatpush3.bf16.msra.mxu1 %v1582_v42  ;;  %4595 = vmatprep.mubr.msk.bf16.mxu1 %vm5263_vm2, %v5262_v13 }
 0x885   : > { %4605 = vmatprep.subr.bf16.mxu1 %v5262_v13 }
 0x8a5   : > { %v1467_v43 = vpop.xlane.xlu0 %1466 }
 0x8a6   : > { %5013 = vrcp.f32 %v1467_v43 }
 0x8a9   : > { %v1697_v50 = vpop.permute.xlu0 %1696 }
 0x8aa   : > { %v1702_v57 = vsel %vm318_vm3, %v1697_v50, 0 }
 0x8ac   : > { %v1464_v44 = vpop.xlane.xlu1 %1463 }
 0x8ad   : > { %5015 = vrcp.f32 %v1464_v44  ;;  %v1695_v56 = vpop.permute.xlu0 %1694 }
 0x8b0   : > { %v5014_v45 = vpop.eup %5013  ;;  %v1748_v46 = vpop.permute.xlu1 %1747 }
 0x8b1   : > { %v1475_v47 = vmul.f32 %v5014_v45, %v5006_v15  ;;  %v1753_v51 = vsel %vm318_vm3, %v1748_v46, 0  ;;  %v1799_v59 = vpop.permute.xlu0 %1798 }
 0x8b2   : > { %v1804_v60 = vsel %vm318_vm3, %v1799_v59, 0 }
 0x8b3   : > { %v1479_v48 = vpack.c.bf16 %v1475_v47, %v1475_v47 }
 0x8b4   : > { %v1746_v49 = vpop.permute.xlu1 %1745 }
 0x8b5   : > { %4602 = vmatmul.mubr.msk.bf16.vlgmr.msra.gmra.mrb[48].mxu0 %vm509_vm4, %v1479_v48  ;;  %v1797_v62 = vpop.permute.xlu0 %1796 }
 0x8b6   : > { %4612 = vmatpush3.bf16.xpose.msra.mxu0 %v1753_v51  ;;  %4613 = vmatprep.mubr.msk.bf16.mxu0 %vm5263_vm2, %v5262_v13 }
 0x8b7   : > { %v5016_v52 = vpop.eup %5015  ;;  %4623 = vmatprep.subr.bf16.mxu0 %v5262_v13 }
 0x8b8   : > { %v1474_v53 = vmul.f32 %v5016_v52, %v5008_v21  ;;  %v1850_v54 = vpop.permute.xlu1 %1849 }
 0x8b9   : > { %v1855_v58 = vsel %vm318_vm3, %v1850_v54, 0 }
 0x8ba   : > { %v1478_v55 = vpack.c.bf16 %v1474_v53, %v1474_v53 }
 0x8bc   : > { %4596 = vmatmul.mubr.msk.bf16.vlgmr.msra.gmra.mrb[44].mxu1 %vm509_vm4, %v1478_v55  ;;  %v1848_v61 = vpop.permute.xlu1 %1847 }
 0x8bd   : > { %4606 = vmatpush3.bf16.xpose.msra.mxu1 %v1702_v57  ;;  %4614 = vmatmul.mubr.msk.bf16.vlgmr.msra.gmra.mrb[52].mxu0 %vm318_vm3, %v1746_v49 }
 0x8be   : > { %4624 = vmatpush3.bf16.xpose.msra.mxu0 %v1855_v58  ;;  %4607 = vmatprep.mubr.msk.bf16.mxu1 %vm5263_vm2, %v5262_v13 }
 0x8bf   : > { %4617 = vmatprep.subr.bf16.mxu1 %v5262_v13  ;;  %4625 = vmatprep.mubr.msk.bf16.mxu0 %vm5263_vm2, %v5262_v13 }
 0x8c0   : > { %4635 = vmatprep.subr.bf16.mxu0 %v5262_v13 }
 0x8c4   : > { %4608 = vmatmul.mubr.msk.bf16.vlgmr.msra.gmra.mrb[48].mxu1 %vm318_vm3, %v1695_v56 }
 0x8c5   : > { %4618 = vmatpush3.bf16.xpose.msra.mxu1 %v1804_v60  ;;  %4626 = vmatmul.mubr.msk.bf16.vlgmr.msra.gmra.mrb[56].mxu0 %vm318_vm3, %v1848_v61 }
 0x8c6   : > { %4619 = vmatprep.mubr.msk.bf16.mxu1 %vm5263_vm2, %v5262_v13  ;;  %4629 = vmatprep.subr.bf16.mxu1 %v5262_v13 }
 0x8c7   : > { %4637 = vmatprep.mubr.msk.bf16.mxu0 %vm5263_vm2, %v5262_v13 }
 0x8cc   : > { %4620 = vmatmul.mubr.msk.bf16.vlgmr.msra.gmra.mrb[52].mxu1 %vm318_vm3, %v1797_v62 }
 0x8cd   : > { %4631 = vmatprep.mubr.msk.bf16.mxu1 %vm5263_vm2, %v5262_v13 }
 0x953   : > { %v5740_v63 = vpop.f32.mrb[44].mxu0 }
 0x954   : > { %v4591_v0 = vpop.f32.mrb[45].mxu0 }
 0x955   : > { %v1573_v1 = vpop.f32.mrb[46].mxu0 }
 0x956   : > { %v4592_v2 = vpop.f32.mrb[47].mxu0  ;;  %v5742_v3 = vpop.f32.mrb[40].mxu1 }
 0x957   : > { %v1672_v4 = vpack.c.bf16 %v5740_v63, %v5742_v3  ;;  %v4585_v5 = vpop.f32.mrb[41].mxu1 }
 0x958   : > { %v1525_v6 = vpop.f32.mrb[42].mxu1 }
 0x959   : > { %v4586_v7 = vpop.f32.mrb[43].mxu1 }
 0x988   : > { %v5746_v8 = vpop.f32.mrb[48].mxu0 }
 0x989   : > { %v4603_v9 = vpop.f32.mrb[49].mxu0 }
 0x98a   : > { %v1669_v10 = vpop.f32.mrb[50].mxu0 }
 0x98b   : > { %v4604_v11 = vpop.f32.mrb[51].mxu0 }
 0x98f   : > { %v5748_v12 = vpop.f32.mrb[44].mxu1 }
 0x990   : > { %v1673_v14 = vpack.c.bf16 %v5746_v8, %v5748_v12  ;;  %v1789_v15 = vpop.f32.mrb[52].mxu0  ;;  %v4597_v17 = vpop.f32.mrb[45].mxu1 }
 0x991   : > { %v4615_v21 = vpop.f32.mrb[53].mxu0  ;;  %v1621_v24 = vpop.f32.mrb[46].mxu1  ;;  %v1900_v26 = vsel %vm509_vm4, %v1789_v15, -inf }
 0x992   : > { %1901 = vmax.xlane.f32.xlu1 %v1900_v26  ;;  %v1792_v27 = vpop.f32.mrb[54].mxu0  ;;  %v4598_v28 = vpop.f32.mrb[47].mxu1 }
 0x993   : > { %v4616_v29 = vpop.f32.mrb[55].mxu0 }
 0x997   : > { %v1738_v30 = vpop.f32.mrb[48].mxu1 }
 0x998   : > { %v1891_v32 = vpop.f32.mrb[56].mxu0  ;;  %v4609_v33 = vpop.f32.mrb[49].mxu1  ;;  %v1897_v34 = vsel %vm509_vm4, %v1738_v30, -inf }
 0x999   : > { %v4627_v37 = vpop.f32.mrb[57].mxu0  ;;  %1898 = vmax.xlane.f32.xlu0 %v1897_v34  ;;  %v1741_v38 = vpop.f32.mrb[50].mxu1  ;;  %v1906_v47 = vsel %vm509_vm4, %v1891_v32, -inf }
 0x99a   : > { %v1894_v39 = vpop.f32.mrb[58].mxu0  ;;  %v4610_v40 = vpop.f32.mrb[51].mxu1 }
 0x99b   : > { %v4628_v41 = vpop.f32.mrb[59].mxu0 }
 0x99f   : > { %v1840_v42 = vpop.f32.mrb[52].mxu1 }
 0x9a0   : > { %v4621_v43 = vpop.f32.mrb[53].mxu1  ;;  %v1903_v44 = vsel %vm509_vm4, %v1840_v42, -inf }
 0x9a1   : > { %1904 = vmax.xlane.f32.xlu0 %v1903_v44  ;;  %v1843_v45 = vpop.f32.mrb[54].mxu1 }
 0x9a2   : > { %v4622_v46 = vpop.f32.mrb[55].mxu1 }
 0x9a3   : > { %1945 = vrot.lane.b32.xlu1 %v5512_v18, %s5274_s25 }
 0x9a5   : > { %1907 = vmax.xlane.f32.xlu0 %v1906_v47 }
 0xa1f   : > { %v1902_v48 = vpop.xlane.xlu1 %1901 }
 0xa20   : > { %v1910_v49 = vsub.f32 %v1789_v15, %v1902_v48 }
 0xa22   : > { %v1915_v50 = vmul.f32 1.442695, %v1910_v49 }
 0xa23   : > { %v1946_v51 = vpop.permute.xlu1 %1945 }
 0xa24   : > { %5017 = vpow2.f32 %v1915_v50  ;;  %v1951_v52 = vsel %vm563_vm5, %v1946_v51, 0 }
 0xa25   : > { %4630 = vmatpush3.bf16.msra.mxu1 %v1951_v52 }
 0xa26   : > { %v1899_v53 = vpop.xlane.xlu0 %1898  ;;  %4641 = vmatprep.subr.bf16.mxu1 %v5262_v13 }
 0xa27   : > { %v1909_v54 = vsub.f32 %v1738_v30, %v1899_v53 }
 0xa29   : > { %v1913_v55 = vmul.f32 1.442695, %v1909_v54 }
 0xa2b   : > { %5019 = vpow2.f32 %v1913_v55 }
 0xa2e   : > { %v5018_v56 = vpop.eup %5017  ;;  %v1905_v59 = vpop.xlane.xlu0 %1904 }
 0xa2f   : > { %v1924_v18 = vsel %vm509_vm4, %v5018_v56, 0.0  ;;  %v1911_v0 = vsub.f32 %v1840_v42, %v1905_v59 }
 0xa30   : > { %1925 = vadd.xlane.f32.xlu0 %v1924_v18 }
 0xa31   : > { %v1917_v1 = vmul.f32 1.442695, %v1911_v0 }
 0xa32   : > { %v1908_v60 = vpop.xlane.xlu0 %1907 }
 0xa33   : > { %v1912_v61 = vsub.f32 %v1891_v32, %v1908_v60 }
 0xa35   : > { %v5020_v57 = vpop.eup %5019  ;;  %v1919_v62 = vmul.f32 1.442695, %v1912_v61 }
 0xa36   : > { %v1921_v58 = vsel %vm509_vm4, %v5020_v57, 0.0 }
 0xa37   : > { %1922 = vadd.xlane.f32.xlu1 %v1921_v58  ;;  %5021 = vpow2.f32 %v1919_v62 }
 0xa38   : > { %5023 = vpow2.f32 %v1917_v1 }
 0xa41   : > { %v5022_v2 = vpop.eup %5021 }
 0xa42   : > { %v1930_v5 = vsel %vm509_vm4, %v5022_v2, 0.0  ;;  %v5024_v6 = vpop.eup %5023 }
 0xa43   : > { %v1927_v7 = vsel %vm509_vm4, %v5024_v6, 0.0 }
 0xa46   : > { %1993 = vrot.lane.b32.xlu0 %v5518_v20, %s5274_s25  ;;  %v2150_v20 = vld [vmem:[#allocation2] sm:$0xff] }
 0xa47   : > { %v5766_v9 = vcombine.low %v2150_v20, %v2150_v20 }
 0xa48   : > { %2041 = vrot.lane.b32.xlu1 %v5510_v16, %s5274_s25  ;;  %v2151_v16 = vld [vmem:[#allocation2 + $0x8] sm:$0xff] }
 0xa49   : > { %v5773_v10 = vcombine.low %v2151_v16, %v2151_v16  ;;  %v5778_v11 = vcombine.high %v2151_v16, %v2151_v16 }
 0xa4c   : > { %2089 = vrot.lane.b32.xlu1 %v5516_v19, %s5274_s25  ;;  %v5770_v19 = vcombine.high %v2150_v20, %v2150_v20  ;;  %s5290_s25 = smov 16  }
 0xa65   : > { %1931 = vadd.xlane.f32.xlu0 %v1930_v5 }
 0xa70   : > { %1928 = vadd.xlane.f32.xlu1 %v1927_v7 }
 0xa7b   : > { %2161 = vrot.lane.b32.xlu0 %v5766_v9, %s5275_s7 }
 0xa7f   : > { %2159 = vrot.lane.b32.xlu0 %v5766_v9, %s5276_s8 }
 0xa81   : > { %2212 = vrot.lane.b32.xlu1 %v5770_v19, %s5275_s7 }
 0xa83   : > { %2263 = vrot.lane.b32.xlu0 %v5773_v10, %s5275_s7 }
 0xa85   : > { %2210 = vrot.lane.b32.xlu1 %v5770_v19, %s5276_s8 }
 0xa87   : > { %2261 = vrot.lane.b32.xlu0 %v5773_v10, %s5276_s8 }
 0xa89   : > { %2314 = vrot.lane.b32.xlu1 %v5778_v11, %s5275_s7  ;;  %s5291_s7 = smov 20  }
 0xa8d   : > { %2312 = vrot.lane.b32.xlu1 %v5778_v11, %s5276_s8  ;;  %s5292_s8 = smov 24  }
 0xabd   : > { %v1926_v15 = vpop.xlane.xlu0 %1925 }
 0xabe   : > { %5025 = vrcp.f32 %v1926_v15 }
 0xac1   : > { %v1994_v17 = vpop.permute.xlu0 %1993 }
 0xac2   : > { %v1999_v21 = vsel %vm563_vm5, %v1994_v17, 0 }
 0xac3   : > { %4636 = vmatpush3.bf16.msra.mxu0 %v1999_v21 }
 0xac4   : > { %v1923_v24 = vpop.xlane.xlu1 %1922  ;;  %4647 = vmatprep.subr.bf16.mxu0 %v5262_v13 }
 0xac5   : > { %5027 = vrcp.f32 %v1923_v24 }
 0xac8   : > { %v5026_v26 = vpop.eup %5025  ;;  %v2042_v27 = vpop.permute.xlu1 %2041 }
 0xac9   : > { %v1938_v28 = vmul.f32 %v5026_v26, %v5018_v56  ;;  %v2047_v38 = vsel %vm563_vm5, %v2042_v27, 0 }
 0xacb   : > { %v1942_v29 = vpack.c.bf16 %v1938_v28, %v1938_v28 }
 0xacc   : > { %v2090_v30 = vpop.permute.xlu1 %2089 }
 0xacd   : > { %v2095_v32 = vsel %vm563_vm5, %v2090_v30, 0  ;;  %4638 = vmatmul.mubr.msk.bf16.vlgmr.msra.gmra.mrb[60].mxu0 %vm509_vm4, %v1942_v29 }
 0xace   : > { %4648 = vmatpush3.bf16.msra.mxu0 %v2095_v32  ;;  %4649 = vmatprep.mubr.msk.bf16.mxu0 %vm5263_vm2, %v5262_v13 }
 0xacf   : > { %v5028_v33 = vpop.eup %5027  ;;  %4659 = vmatprep.subr.bf16.mxu0 %v5262_v13 }
 0xad0   : > { %v1937_v34 = vmul.f32 %v5028_v33, %v5020_v57 }
 0xad2   : > { %v1941_v37 = vpack.c.bf16 %v1937_v34, %v1937_v34 }
 0xad4   : > { %4632 = vmatmul.mubr.msk.bf16.vlgmr.msra.gmra.mrb[56].mxu1 %vm509_vm4, %v1941_v37 }
 0xad5   : > { %4642 = vmatpush3.bf16.msra.mxu1 %v2047_v38  ;;  %4643 = vmatprep.mubr.msk.bf16.mxu1 %vm5263_vm2, %v5262_v13 }
 0xad6   : > { %4653 = vmatprep.subr.bf16.mxu1 %v5262_v13 }
 0xaf2   : > { %v1932_v39 = vpop.xlane.xlu0 %1931 }
 0xaf3   : > { %5029 = vrcp.f32 %v1932_v39 }
 0xaf6   : > { %v2162_v47 = vpop.permute.xlu0 %2161 }
 0xaf7   : > { %v2167_v54 = vsel %vm318_vm3, %v2162_v47, 0 }
 0xafa   : > { %v2160_v53 = vpop.permute.xlu0 %2159 }
 0xafd   : > { %v5030_v40 = vpop.eup %5029  ;;  %v1929_v41 = vpop.xlane.xlu1 %1928 }
 0xafe   : > { %v1940_v42 = vmul.f32 %v5030_v40, %v5022_v2  ;;  %5031 = vrcp.f32 %v1929_v41  ;;  %v2264_v56 = vpop.permute.xlu0 %2263 }
 0xaff   : > { %v2269_v18 = vsel %vm318_vm3, %v2264_v56, 0 }
 0xb00   : > { %v1944_v43 = vpack.c.bf16 %v1940_v42, %v1940_v42 }
 0xb01   : > { %v2213_v44 = vpop.permute.xlu1 %2212 }
 0xb02   : > { %v2218_v45 = vsel %vm318_vm3, %v2213_v44, 0  ;;  %4650 = vmatmul.mubr.msk.bf16.vlgmr.msra.gmra.mrb[64].mxu0 %vm509_vm4, %v1944_v43  ;;  %v2262_v57 = vpop.permute.xlu0 %2261 }
 0xb03   : > { %4660 = vmatpush3.bf16.xpose.msra.mxu0 %v2218_v45  ;;  %4661 = vmatprep.mubr.msk.bf16.mxu0 %vm5263_vm2, %v5262_v13 }
 0xb04   : > { %4671 = vmatprep.subr.bf16.mxu0 %v5262_v13 }
 0xb05   : > { %v2211_v46 = vpop.permute.xlu1 %2210 }
 0xb08   : > { %v5032_v48 = vpop.eup %5031 }
 0xb09   : > { %v1939_v49 = vmul.f32 %v5032_v48, %v5024_v6  ;;  %v2315_v50 = vpop.permute.xlu1 %2314 }
 0xb0a   : > { %v2320_v51 = vsel %vm318_vm3, %v2315_v50, 0  ;;  %4662 = vmatmul.mubr.msk.bf16.vlgmr.msra.gmra.mrb[68].mxu0 %vm318_vm3, %v2211_v46 }
 0xb0b   : > { %4672 = vmatpush3.bf16.xpose.msra.mxu0 %v2320_v51  ;;  %v1943_v52 = vpack.c.bf16 %v1939_v49, %v1939_v49  ;;  %4673 = vmatprep.mubr.msk.bf16.mxu0 %vm5263_vm2, %v5262_v13 }
 0xb0c   : > { %4683 = vmatprep.subr.bf16.mxu0 %v5262_v13 }
 0xb0d   : > { %4644 = vmatmul.mubr.msk.bf16.vlgmr.msra.gmra.mrb[60].mxu1 %vm509_vm4, %v1943_v52  ;;  %v2313_v55 = vpop.permute.xlu1 %2312 }
 0xb0e   : > { %4654 = vmatpush3.bf16.xpose.msra.mxu1 %v2167_v54  ;;  %4655 = vmatprep.mubr.msk.bf16.mxu1 %vm5263_vm2, %v5262_v13 }
 0xb0f   : > { %4665 = vmatprep.subr.bf16.mxu1 %v5262_v13 }
 0xb12   : > { %4674 = vmatmul.mubr.msk.bf16.vlgmr.msra.gmra.mrb[72].mxu0 %vm318_vm3, %v2313_v55 }
 0xb13   : > { %4685 = vmatprep.mubr.msk.bf16.mxu0 %vm5263_vm2, %v5262_v13 }
 0xb15   : > { %4656 = vmatmul.mubr.msk.bf16.vlgmr.msra.gmra.mrb[64].mxu1 %vm318_vm3, %v2160_v53 }
 0xb16   : > { %4666 = vmatpush3.bf16.xpose.msra.mxu1 %v2269_v18  ;;  %4667 = vmatprep.mubr.msk.bf16.mxu1 %vm5263_vm2, %v5262_v13 }
 0xb17   : > { %4677 = vmatprep.subr.bf16.mxu1 %v5262_v13 }
 0xb1d   : > { %4668 = vmatmul.mubr.msk.bf16.vlgmr.msra.gmra.mrb[68].mxu1 %vm318_vm3, %v2262_v57 }
 0xb1e   : > { %4679 = vmatprep.mubr.msk.bf16.mxu1 %vm5263_vm2, %v5262_v13 }
 0xba0   : > { %v5820_v58 = vpop.f32.mrb[60].mxu0 }
 0xba1   : > { %v4639_v59 = vpop.f32.mrb[61].mxu0 }
 0xba2   : > { %v2038_v60 = vpop.f32.mrb[62].mxu0 }
 0xba3   : > { %v4640_v61 = vpop.f32.mrb[63].mxu0 }
 0xba7   : > { %v5822_v62 = vpop.f32.mrb[56].mxu1 }
 0xba8   : > { %v2137_v0 = vpack.c.bf16 %v5820_v58, %v5822_v62  ;;  %v4633_v1 = vpop.f32.mrb[57].mxu1 }
 0xba9   : > { %v1990_v2 = vpop.f32.mrb[58].mxu1 }
 0xbaa   : > { %v4634_v5 = vpop.f32.mrb[59].mxu1 }
 0xbd5   : > { %v5826_v6 = vpop.f32.mrb[64].mxu0 }
 0xbd6   : > { %v4651_v7 = vpop.f32.mrb[65].mxu0 }
 0xbd7   : > { %v2134_v20 = vpop.f32.mrb[66].mxu0 }
 0xbd8   : > { %v4652_v16 = vpop.f32.mrb[67].mxu0 }
 0xbdd   : > { %v2254_v15 = vpop.f32.mrb[68].mxu0 }
 0xbde   : > { %v4663_v17 = vpop.f32.mrb[69].mxu0  ;;  %v2365_v21 = vsel %vm509_vm4, %v2254_v15, -inf }
 0xbdf   : > { %2366 = vmax.xlane.f32.xlu1 %v2365_v21  ;;  %v2257_v24 = vpop.f32.mrb[70].mxu0 }
 0xbe0   : > { %v5829_v26 = vpop.f32.mrb[60].mxu1  ;;  %v4664_v27 = vpop.f32.mrb[71].mxu0 }
 0xbe1   : > { %v2138_v28 = vpack.c.bf16 %v5826_v6, %v5829_v26  ;;  %v4645_v29 = vpop.f32.mrb[61].mxu1 }
 0xbe2   : > { %v2086_v30 = vpop.f32.mrb[62].mxu1 }
 0xbe3   : > { %v4646_v32 = vpop.f32.mrb[63].mxu1 }
 0xbe5   : > { %v2356_v33 = vpop.f32.mrb[72].mxu0 }
 0xbe6   : > { %v4675_v34 = vpop.f32.mrb[73].mxu0  ;;  %v2371_v49 = vsel %vm509_vm4, %v2356_v33, -inf }
 0xbe7   : > { %v2359_v37 = vpop.f32.mrb[74].mxu0 }
 0xbe8   : > { %v2203_v38 = vpop.f32.mrb[64].mxu1  ;;  %v4676_v39 = vpop.f32.mrb[75].mxu0 }
 0xbe9   : > { %v4657_v40 = vpop.f32.mrb[65].mxu1  ;;  %v2362_v41 = vsel %vm509_vm4, %v2203_v38, -inf }
 0xbea   : > { %2363 = vmax.xlane.f32.xlu0 %v2362_v41  ;;  %v2206_v42 = vpop.f32.mrb[66].mxu1 }
 0xbeb   : > { %v4658_v43 = vpop.f32.mrb[67].mxu1 }
 0xbf0   : > { %2410 = vrot.lane.b32.xlu1 %v5766_v9, %s5277_s21  ;;  %v2305_v44 = vpop.f32.mrb[68].mxu1 }
 0xbf1   : > { %v4669_v45 = vpop.f32.mrb[69].mxu1  ;;  %v2368_v46 = vsel %vm509_vm4, %v2305_v44, -inf }
 0xbf2   : > { %2369 = vmax.xlane.f32.xlu0 %v2368_v46  ;;  %v2308_v47 = vpop.f32.mrb[70].mxu1 }
 0xbf3   : > { %v4670_v48 = vpop.f32.mrb[71].mxu1 }
 0xbf6   : > { %2372 = vmax.xlane.f32.xlu0 %v2371_v49 }
 0xc6c   : > { %v2367_v50 = vpop.xlane.xlu1 %2366 }
 0xc6d   : > { %v2375_v51 = vsub.f32 %v2254_v15, %v2367_v50 }
 0xc6f   : > { %v2380_v52 = vmul.f32 1.442695, %v2375_v51 }
 0xc70   : > { %v2411_v53 = vpop.permute.xlu1 %2410 }
 0xc71   : > { %5033 = vpow2.f32 %v2380_v52  ;;  %v2416_v54 = vsel %vm563_vm5, %v2411_v53, 0 }
 0xc72   : > { %4678 = vmatpush3.bf16.msra.mxu1 %v2416_v54 }
 0xc73   : > { %4689 = vmatprep.subr.bf16.mxu1 %v5262_v13 }
 0xc77   : > { %v2364_v55 = vpop.xlane.xlu0 %2363 }
 0xc78   : > { %v2374_v56 = vsub.f32 %v2203_v38, %v2364_v55 }
 0xc7a   : > { %v2378_v18 = vmul.f32 1.442695, %v2374_v56 }
 0xc7b   : > { %v5034_v57 = vpop.eup %5033 }
 0xc7c   : > { %5035 = vpow2.f32 %v2378_v18  ;;  %v2389_v59 = vsel %vm509_vm4, %v5034_v57, 0.0 }
 0xc7d   : > { %2390 = vadd.xlane.f32.xlu0 %v2389_v59 }
 0xc7f   : > { %v2370_v1 = vpop.xlane.xlu0 %2369 }
 0xc80   : > { %v2376_v20 = vsub.f32 %v2305_v44, %v2370_v1 }
 0xc82   : > { %v2382_v15 = vmul.f32 1.442695, %v2376_v20 }
 0xc83   : > { %v2373_v2 = vpop.xlane.xlu0 %2372 }
 0xc84   : > { %v2377_v5 = vsub.f32 %v2356_v33, %v2373_v2 }
 0xc86   : > { %v5036_v60 = vpop.eup %5035  ;;  %v2384_v7 = vmul.f32 1.442695, %v2377_v5 }
 0xc87   : > { %v2386_v61 = vsel %vm509_vm4, %v5036_v60, 0.0 }
 0xc88   : > { %2387 = vadd.xlane.f32.xlu1 %v2386_v61  ;;  %5037 = vpow2.f32 %v2384_v7 }
 0xc89   : > { %5039 = vpow2.f32 %v2382_v15 }
 0xc92   : > { %v5038_v16 = vpop.eup %5037 }
 0xc93   : > { %2458 = vrot.lane.b32.xlu0 %v5770_v19, %s5277_s21  ;;  %v2395_v17 = vsel %vm509_vm4, %v5038_v16, 0.0  ;;  %v5040_v21 = vpop.eup %5039 }
 0xc94   : > { %v2392_v24 = vsel %vm509_vm4, %v5040_v21, 0.0 }
 0xc99   : > { %2506 = vrot.lane.b32.xlu1 %v5773_v10, %s5277_s21 }
 0xc9d   : > { %2554 = vrot.lane.b32.xlu1 %v5778_v11, %s5277_s21  ;;  %s5293_s21 = smov 28  }
 0xcb2   : > { %2396 = vadd.xlane.f32.xlu0 %v2395_v17 }
 0xcc1   : > { %2393 = vadd.xlane.f32.xlu1 %v2392_v24 }
 0xcc8   : > { %2626 = vrot.lane.b32.xlu0 %v5766_v9, %s5278_s29 }
 0xccc   : > { %2624 = vrot.lane.b32.xlu0 %v5766_v9, %s5279_s30 }
 0xcd0   : > { %2728 = vrot.lane.b32.xlu0 %v5773_v10, %s5278_s29 }
 0xcd2   : > { %2677 = vrot.lane.b32.xlu1 %v5770_v19, %s5278_s29 }
 0xcd4   : > { %2726 = vrot.lane.b32.xlu0 %v5773_v10, %s5279_s30 }
 0xcd6   : > { %2675 = vrot.lane.b32.xlu1 %v5770_v19, %s5279_s30 }
 0xcda   : > { %2779 = vrot.lane.b32.xlu1 %v5778_v11, %s5278_s29  ;;  %s217_s29 = scalar_lea.vmem [#allocation10], %s4202_s22 }
 0xcde   : > { %2777 = vrot.lane.b32.xlu1 %v5778_v11, %s5279_s30  ;;  %s4101_s30 = sshll.u32 %s217_s29, 4  ;;  %s6134_s30 = int_to_ptr.vmem [resolvable:$true] %s4101_s30 }
 0xcdf   : > { %s5183_s22 = scalar_lea.vmem %s6134_s30, 512 }
 0xce0   : > { %p5184_p11 = scmp.ne.s32.totalorder %s6134_s30, %s5183_s22 }
 0xce2   : > { %p5185_p1 = pnand %p5184_p11, %p6204_p0 }
 0xce4   : > { %p5186_p3 = pneg %p5185_p1 }
 0xd0a   : > { %v2391_v27 = vpop.xlane.xlu0 %2390 }
 0xd0b   : > { %5041 = vrcp.f32 %v2391_v27 }
 0xd0e   : > { %v2459_v29 = vpop.permute.xlu0 %2458 }
 0xd0f   : > { %v2464_v30 = vsel %vm563_vm5, %v2459_v29, 0 }
 0xd10   : > { %4684 = vmatpush3.bf16.msra.mxu0 %v2464_v30 }
 0xd11   : > { %4695 = vmatprep.subr.bf16.mxu0 %v5262_v13 }
 0xd15   : > { %v5042_v32 = vpop.eup %5041  ;;  %v2388_v33 = vpop.xlane.xlu1 %2387 }
 0xd16   : > { %v2403_v34 = vmul.f32 %v5042_v32, %v5034_v57  ;;  %5043 = vrcp.f32 %v2388_v33 }
 0xd18   : > { %v2407_v37 = vpack.c.bf16 %v2403_v34, %v2403_v34 }
 0xd19   : > { %v2507_v38 = vpop.permute.xlu1 %2506 }
 0xd1a   : > { %4686 = vmatmul.mubr.msk.bf16.vlgmr.msra.gmra.mrb[76].mxu0 %vm509_vm4, %v2407_v37  ;;  %v2512_v44 = vsel %vm563_vm5, %v2507_v38, 0 }
 0xd1b   : > { %4697 = vmatprep.mubr.msk.bf16.mxu0 %vm5263_vm2, %v5262_v13 }
 0xd1d   : > { %v2555_v39 = vpop.permute.xlu1 %2554 }
 0xd1e   : > { %v2560_v40 = vsel %vm563_vm5, %v2555_v39, 0 }
 0xd1f   : > { %4696 = vmatpush3.bf16.msra.mxu0 %v2560_v40 }
 0xd20   : > { %v5044_v41 = vpop.eup %5043  ;;  %4707 = vmatprep.subr.bf16.mxu0 %v5262_v13 }
 0xd21   : > { %v2402_v42 = vmul.f32 %v5044_v41, %v5036_v60 }
 0xd23   : > { %v2406_v43 = vpack.c.bf16 %v2402_v42, %v2402_v42 }
 0xd25   : > { %4680 = vmatmul.mubr.msk.bf16.vlgmr.msra.gmra.mrb[72].mxu1 %vm509_vm4, %v2406_v43 }
 0xd26   : > { %4690 = vmatpush3.bf16.msra.mxu1 %v2512_v44  ;;  %4691 = vmatprep.mubr.msk.bf16.mxu1 %vm5263_vm2, %v5262_v13 }
 0xd27   : > { %4701 = vmatprep.subr.bf16.mxu1 %v5262_v13 }
 0xd3f   : > { %v2397_v45 = vpop.xlane.xlu0 %2396 }
 0xd40   : > { %5045 = vrcp.f32 %v2397_v45 }
 0xd43   : > { %v2627_v53 = vpop.permute.xlu0 %2626 }
 0xd44   : > { %v2632_v60 = vsel %vm318_vm3, %v2627_v53, 0 }
 0xd47   : > { %v2625_v59 = vpop.permute.xlu0 %2624 }
 0xd4a   : > { %v5046_v46 = vpop.eup %5045 }
 0xd4b   : > { %v2405_v47 = vmul.f32 %v5046_v46, %v5038_v16  ;;  %v2729_v1 = vpop.permute.xlu0 %2728 }
 0xd4c   : > { %v2734_v2 = vsel %vm318_vm3, %v2729_v1, 0 }
 0xd4d   : > { %v2409_v48 = vpack.c.bf16 %v2405_v47, %v2405_v47 }
 0xd4e   : > { %v2394_v49 = vpop.xlane.xlu1 %2393 }
 0xd4f   : > { %5047 = vrcp.f32 %v2394_v49  ;;  %4698 = vmatmul.mubr.msk.bf16.vlgmr.msra.gmra.mrb[80].mxu0 %vm509_vm4, %v2409_v48  ;;  %v2727_v5 = vpop.permute.xlu0 %2726 }
 0xd50   : > { %4709 = vmatprep.mubr.msk.bf16.mxu0 %vm5263_vm2, %v5262_v13 }
 0xd52   : > { %v2678_v50 = vpop.permute.xlu1 %2677 }
 0xd53   : > { %v2683_v51 = vsel %vm318_vm3, %v2678_v50, 0 }
 0xd54   : > { %4708 = vmatpush3.bf16.xpose.msra.mxu0 %v2683_v51 }
 0xd55   : > { %4719 = vmatprep.subr.bf16.mxu0 %v5262_v13 }
 0xd56   : > { %v2676_v52 = vpop.permute.xlu1 %2675 }
 0xd59   : > { %v5048_v54 = vpop.eup %5047 }
 0xd5a   : > { %v2404_v55 = vmul.f32 %v5048_v54, %v5040_v21  ;;  %v2780_v56 = vpop.permute.xlu1 %2779 }
 0xd5b   : > { %v2785_v18 = vsel %vm318_vm3, %v2780_v56, 0  ;;  %4710 = vmatmul.mubr.msk.bf16.vlgmr.msra.gmra.mrb[84].mxu0 %vm318_vm3, %v2676_v52 }
 0xd5c   : > { %4720 = vmatpush3.bf16.xpose.msra.mxu0 %v2785_v18  ;;  %v2408_v57 = vpack.c.bf16 %v2404_v55, %v2404_v55  ;;  %4721 = vmatprep.mubr.msk.bf16.mxu0 %vm5263_vm2, %v5262_v13 }
 0xd5d   : > { %4731 = vmatprep.subr.bf16.mxu0 %v5262_v13 }
 0xd5e   : > { %4692 = vmatmul.mubr.msk.bf16.vlgmr.msra.gmra.mrb[76].mxu1 %vm509_vm4, %v2408_v57  ;;  %v2778_v61 = vpop.permute.xlu1 %2777 }
 0xd5f   : > { %4702 = vmatpush3.bf16.xpose.msra.mxu1 %v2632_v60  ;;  %4703 = vmatprep.mubr.msk.bf16.mxu1 %vm5263_vm2, %v5262_v13 }
 0xd60   : > { %4713 = vmatprep.subr.bf16.mxu1 %v5262_v13 }
 0xd63   : > { %4722 = vmatmul.mubr.msk.bf16.vlgmr.msra.gmra.mrb[88].mxu0 %vm318_vm3, %v2778_v61 }
 0xd64   : > { %4733 = vmatprep.mubr.msk.bf16.mxu0 %vm5263_vm2, %v5262_v13 }
 0xd66   : > { %4704 = vmatmul.mubr.msk.bf16.vlgmr.msra.gmra.mrb[80].mxu1 %vm318_vm3, %v2625_v59 }
 0xd67   : > { %4714 = vmatpush3.bf16.xpose.msra.mxu1 %v2734_v2  ;;  %4715 = vmatprep.mubr.msk.bf16.mxu1 %vm5263_vm2, %v5262_v13 }
 0xd68   : > { %4725 = vmatprep.subr.bf16.mxu1 %v5262_v13 }
 0xd6e   : > { %4716 = vmatmul.mubr.msk.bf16.vlgmr.msra.gmra.mrb[84].mxu1 %vm318_vm3, %v2727_v5 }
 0xd6f   : > { %4727 = vmatprep.mubr.msk.bf16.mxu1 %vm5263_vm2, %v5262_v13 }
 0xded   : > { %v5896_v7 = vpop.f32.mrb[76].mxu0 }
 0xdee   : > { %v4687_v20 = vpop.f32.mrb[77].mxu0 }
 0xdef   : > { %v2503_v16 = vpop.f32.mrb[78].mxu0 }
 0xdf0   : > { %v4688_v15 = vpop.f32.mrb[79].mxu0 }
 0xdf8   : > { %v5898_v17 = vpop.f32.mrb[72].mxu1 }
 0xdf9   : > { %v2602_v21 = vpack.c.bf16 %v5896_v7, %v5898_v17  ;;  %v4681_v24 = vpop.f32.mrb[73].mxu1 }
 0xdfa   : > { %v2455_v27 = vpop.f32.mrb[74].mxu1 }
 0xdfb   : > { %v4682_v29 = vpop.f32.mrb[75].mxu1 }
 0xe22   : > { %v5902_v30 = vpop.f32.mrb[80].mxu0 }
 0xe23   : > { %v4699_v32 = vpop.f32.mrb[81].mxu0 }
 0xe24   : > { %v2599_v33 = vpop.f32.mrb[82].mxu0 }
 0xe25   : > { %v4700_v34 = vpop.f32.mrb[83].mxu0 }
 0xe2e   : > { %v2719_v37 = vpop.f32.mrb[84].mxu0 }
 0xe2f   : > { %v4711_v38 = vpop.f32.mrb[85].mxu0  ;;  %v2830_v39 = vsel %vm509_vm4, %v2719_v37, -inf }
 0xe30   : > { %2831 = vmax.xlane.f32.xlu1 %v2830_v39  ;;  %v2722_v40 = vpop.f32.mrb[86].mxu0 }
 0xe31   : > { %v5905_v41 = vpop.f32.mrb[76].mxu1  ;;  %v4712_v42 = vpop.f32.mrb[87].mxu0 }
 0xe32   : > { %v2603_v43 = vpack.c.bf16 %v5902_v30, %v5905_v41  ;;  %v4693_v44 = vpop.f32.mrb[77].mxu1 }
 0xe33   : > { %v2551_v45 = vpop.f32.mrb[78].mxu1 }
 0xe34   : > { %v4694_v46 = vpop.f32.mrb[79].mxu1 }
 0xe36   : > { %v2821_v47 = vpop.f32.mrb[88].mxu0 }
 0xe37   : > { %v4723_v48 = vpop.f32.mrb[89].mxu0  ;;  %v2836_v61 = vsel %vm509_vm4, %v2821_v47, -inf }
 0xe38   : > { %v2824_v49 = vpop.f32.mrb[90].mxu0 }
 0xe39   : > { %v2668_v50 = vpop.f32.mrb[80].mxu1  ;;  %v4724_v51 = vpop.f32.mrb[91].mxu0 }
 0xe3a   : > { %v4705_v52 = vpop.f32.mrb[81].mxu1  ;;  %v2827_v53 = vsel %vm509_vm4, %v2668_v50, -inf }
 0xe3b   : > { %2828 = vmax.xlane.f32.xlu0 %v2827_v53  ;;  %v2671_v54 = vpop.f32.mrb[82].mxu1 }
 0xe3c   : > { %v4706_v55 = vpop.f32.mrb[83].mxu1 }
 0xe41   : > { %2875 = vrot.lane.b32.xlu1 %v5766_v9, %s5280_s18  ;;  %v2770_v56 = vpop.f32.mrb[84].mxu1 }
 0xe42   : > { %v4717_v18 = vpop.f32.mrb[85].mxu1  ;;  %v2833_v57 = vsel %vm509_vm4, %v2770_v56, -inf }
 0xe43   : > { %2834 = vmax.xlane.f32.xlu0 %v2833_v57  ;;  %v2773_v59 = vpop.f32.mrb[86].mxu1 }
 0xe44   : > { %v4718_v60 = vpop.f32.mrb[87].mxu1 }
 0xe47   : > { %2837 = vmax.xlane.f32.xlu0 %v2836_v61 }
 0xebd   : > { %v2832_v1 = vpop.xlane.xlu1 %2831 }
 0xebe   : > { %v2840_v2 = vsub.f32 %v2719_v37, %v2832_v1 }
 0xec0   : > { %v2845_v5 = vmul.f32 1.442695, %v2840_v2 }
 0xec1   : > { %v2876_v20 = vpop.permute.xlu1 %2875 }
 0xec2   : > { %5049 = vpow2.f32 %v2845_v5  ;;  %v2881_v16 = vsel %vm563_vm5, %v2876_v20, 0 }
 0xec3   : > { %4726 = vmatpush3.bf16.msra.mxu1 %v2881_v16 }
 0xec4   : > { %4737 = vmatprep.subr.bf16.mxu1 %v5262_v13 }
 0xec8   : > { %v2829_v15 = vpop.xlane.xlu0 %2828 }
 0xec9   : > { %v2839_v24 = vsub.f32 %v2668_v50, %v2829_v15 }
 0xecb   : > { %v2843_v27 = vmul.f32 1.442695, %v2839_v24 }
 0xecc   : > { %v5050_v29 = vpop.eup %5049 }
 0xecd   : > { %5051 = vpow2.f32 %v2843_v27  ;;  %v2854_v32 = vsel %vm509_vm4, %v5050_v29, 0.0 }
 0xece   : > { %2855 = vadd.xlane.f32.xlu0 %v2854_v32 }
 0xed0   : > { %v2835_v37 = vpop.xlane.xlu0 %2834 }
 0xed1   : > { %v2841_v42 = vsub.f32 %v2770_v56, %v2835_v37 }
 0xed3   : > { %v2847_v45 = vmul.f32 1.442695, %v2841_v42 }
 0xed4   : > { %v2838_v38 = vpop.xlane.xlu0 %2837 }
 0xed5   : > { %v2842_v39 = vsub.f32 %v2821_v47, %v2838_v38 }
 0xed7   : > { %v5052_v33 = vpop.eup %5051  ;;  %v2849_v40 = vmul.f32 1.442695, %v2842_v39 }
 0xed8   : > { %v2851_v34 = vsel %vm509_vm4, %v5052_v33, 0.0 }
 0xed9   : > { %2852 = vadd.xlane.f32.xlu1 %v2851_v34  ;;  %5053 = vpow2.f32 %v2849_v40 }
 0xeda   : > { %5055 = vpow2.f32 %v2847_v45 }
 0xee3   : > { %v5054_v44 = vpop.eup %5053 }
 0xee4   : > { %2923 = vrot.lane.b32.xlu0 %v5770_v19, %s5280_s18  ;;  %v2860_v46 = vsel %vm509_vm4, %v5054_v44, 0.0  ;;  %v5056_v48 = vpop.eup %5055 }
 0xee5   : > { %v2857_v49 = vsel %vm509_vm4, %v5056_v48, 0.0 }
 0xeea   : > { %2971 = vrot.lane.b32.xlu1 %v5773_v10, %s5280_s18 }
 0xeee   : > { %3019 = vrot.lane.b32.xlu1 %v5778_v11, %s5280_s18  ;;  %s4316_s18 = sshll.u32 %s5337_s16, 9  ;;  %s4088_s16 = scalar_lea.sflag [#allocation6], %s5488_s28 }
 0xf03   : > { %2861 = vadd.xlane.f32.xlu0 %v2860_v46 }
 0xf12   : > { %2858 = vadd.xlane.f32.xlu1 %v2857_v49 }
 0xf19   : > { %3091 = vrot.lane.b32.xlu0 %v5766_v9, %s5281_s20 }
 0xf1d   : > { %3089 = vrot.lane.b32.xlu0 %v5766_v9, %s5282_s17 }
 0xf21   : > { %3193 = vrot.lane.b32.xlu0 %v5773_v10, %s5281_s20 }
 0xf23   : > { %3142 = vrot.lane.b32.xlu1 %v5770_v19, %s5281_s20 }
 0xf25   : > { %3191 = vrot.lane.b32.xlu0 %v5773_v10, %s5282_s17 }
 0xf27   : > { %3140 = vrot.lane.b32.xlu1 %v5770_v19, %s5282_s17 }
 0xf2b   : > { %3244 = vrot.lane.b32.xlu1 %v5778_v11, %s5281_s20 }
 0xf2f   : > { %3242 = vrot.lane.b32.xlu1 %v5778_v11, %s5282_s17 }
 0xf5b   : > { %v2856_v47 = vpop.xlane.xlu0 %2855 }
 0xf5c   : > { %5057 = vrcp.f32 %v2856_v47 }
 0xf5f   : > { %v2924_v50 = vpop.permute.xlu0 %2923 }
 0xf60   : > { %v2929_v51 = vsel %vm563_vm5, %v2924_v50, 0 }
 0xf61   : > { %4732 = vmatpush3.bf16.msra.mxu0 %v2929_v51 }
 0xf62   : > { %4743 = vmatprep.subr.bf16.mxu0 %v5262_v13 }
 0xf66   : > { %v5058_v52 = vpop.eup %5057  ;;  %v2853_v53 = vpop.xlane.xlu1 %2852 }
 0xf67   : > { %v2868_v54 = vmul.f32 %v5058_v52, %v5050_v29  ;;  %5059 = vrcp.f32 %v2853_v53 }
 0xf69   : > { %v2872_v55 = vpack.c.bf16 %v2868_v54, %v2868_v54 }
 0xf6a   : > { %v2972_v56 = vpop.permute.xlu1 %2971 }
 0xf6b   : > { %4734 = vmatmul.mubr.msk.bf16.vlgmr.msra.gmra.mrb[92].mxu0 %vm509_vm4, %v2872_v55  ;;  %v2977_v1 = vsel %vm563_vm5, %v2972_v56, 0 }
 0xf6c   : > { %4745 = vmatprep.mubr.msk.bf16.mxu0 %vm5263_vm2, %v5262_v13 }
 0xf6e   : > { %v3020_v18 = vpop.permute.xlu1 %3019 }
 0xf6f   : > { %v3025_v57 = vsel %vm563_vm5, %v3020_v18, 0 }
 0xf70   : > { %4744 = vmatpush3.bf16.msra.mxu0 %v3025_v57 }
 0xf71   : > { %v5060_v59 = vpop.eup %5059  ;;  %4755 = vmatprep.subr.bf16.mxu0 %v5262_v13 }
 0xf72   : > { %v2867_v60 = vmul.f32 %v5060_v59, %v5052_v33 }
 0xf74   : > { %v2871_v61 = vpack.c.bf16 %v2867_v60, %v2867_v60 }
 0xf76   : > { %4728 = vmatmul.mubr.msk.bf16.vlgmr.msra.gmra.mrb[88].mxu1 %vm509_vm4, %v2871_v61 }
 0xf77   : > { %4738 = vmatpush3.bf16.msra.mxu1 %v2977_v1  ;;  %4739 = vmatprep.mubr.msk.bf16.mxu1 %vm5263_vm2, %v5262_v13 }
 0xf78   : > { %4749 = vmatprep.subr.bf16.mxu1 %v5262_v13 }
 0xf90   : > { %v2862_v2 = vpop.xlane.xlu0 %2861 }
 0xf91   : > { %5061 = vrcp.f32 %v2862_v2 }
 0xf94   : > { %v3092_v32 = vpop.permute.xlu0 %3091 }
 0xf95   : > { %v3097_v42 = vsel %vm318_vm3, %v3092_v32, 0 }
 0xf98   : > { %v3090_v40 = vpop.permute.xlu0 %3089 }
 0xf9b   : > { %v5062_v5 = vpop.eup %5061 }
 0xf9c   : > { %v2870_v20 = vmul.f32 %v5062_v5, %v5054_v44  ;;  %v3194_v45 = vpop.permute.xlu0 %3193 }
 0xf9d   : > { %v3199_v46 = vsel %vm318_vm3, %v3194_v45, 0 }
 0xf9e   : > { %v2874_v16 = vpack.c.bf16 %v2870_v20, %v2870_v20 }
 0xf9f   : > { %v2859_v15 = vpop.xlane.xlu1 %2858 }
 0xfa0   : > { %5063 = vrcp.f32 %v2859_v15  ;;  %4746 = vmatmul.mubr.msk.bf16.vlgmr.msra.gmra.mrb[96].mxu0 %vm509_vm4, %v2874_v16 }
 0xfa1   : > { %4757 = vmatprep.mubr.msk.bf16.mxu0 %vm5263_vm2, %v5262_v13 }
 0xfa3   : > { %v3143_v24 = vpop.permute.xlu1 %3142 }
 0xfa4   : > { %v3148_v27 = vsel %vm318_vm3, %v3143_v24, 0 }
 0xfa5   : > { %4756 = vmatpush3.bf16.xpose.msra.mxu0 %v3148_v27 }
 0xfa6   : > { %4767 = vmatprep.subr.bf16.mxu0 %v5262_v13 }
 0xfa7   : > { %v3141_v29 = vpop.permute.xlu1 %3140 }
 0xfaa   : > { %v5064_v33 = vpop.eup %5063 }
 0xfab   : > { %v2869_v34 = vmul.f32 %v5064_v33, %v5056_v48  ;;  %v3245_v37 = vpop.permute.xlu1 %3244  ;;  %v3192_v48 = vpop.permute.xlu0 %3191 }
 0xfac   : > { %v3250_v38 = vsel %vm318_vm3, %v3245_v37, 0  ;;  %4758 = vmatmul.mubr.msk.bf16.vlgmr.msra.gmra.mrb[100].mxu0 %vm318_vm3, %v3141_v29 }
 0xfad   : > { %4768 = vmatpush3.bf16.xpose.msra.mxu0 %v3250_v38  ;;  %v2873_v39 = vpack.c.bf16 %v2869_v34, %v2869_v34  ;;  %4769 = vmatprep.mubr.msk.bf16.mxu0 %vm5263_vm2, %v5262_v13 }
 0xfae   : > { %4779 = vmatprep.subr.bf16.mxu0 %v5262_v13 }
 0xfaf   : > { %4740 = vmatmul.mubr.msk.bf16.vlgmr.msra.gmra.mrb[92].mxu1 %vm509_vm4, %v2873_v39  ;;  %v3243_v44 = vpop.permute.xlu1 %3242 }
 0xfb0   : > { %4750 = vmatpush3.bf16.xpose.msra.mxu1 %v3097_v42  ;;  %4751 = vmatprep.mubr.msk.bf16.mxu1 %vm5263_vm2, %v5262_v13 }
 0xfb1   : > { %4761 = vmatprep.subr.bf16.mxu1 %v5262_v13 }
 0xfb4   : > { %4770 = vmatmul.mubr.msk.bf16.vlgmr.msra.gmra.mrb[104].mxu0 %vm318_vm3, %v3243_v44 }
 0xfb5   : > { %4781 = vmatprep.mubr.msk.bf16.mxu0 %vm5263_vm2, %v5262_v13 }
 0xfb7   : > { %4752 = vmatmul.mubr.msk.bf16.vlgmr.msra.gmra.mrb[96].mxu1 %vm318_vm3, %v3090_v40 }
 0xfb8   : > { %4762 = vmatpush3.bf16.xpose.msra.mxu1 %v3199_v46  ;;  %4763 = vmatprep.mubr.msk.bf16.mxu1 %vm5263_vm2, %v5262_v13 }
 0xfb9   : > { %4773 = vmatprep.subr.bf16.mxu1 %v5262_v13 }
 0xfbf   : > { %4764 = vmatmul.mubr.msk.bf16.vlgmr.msra.gmra.mrb[100].mxu1 %vm318_vm3, %v3192_v48 }
 0xfc0   : > { %4775 = vmatprep.mubr.msk.bf16.mxu1 %vm5263_vm2, %v5262_v13 }
0x103e   : > { %v5972_v49 = vpop.f32.mrb[92].mxu0 }
0x103f   : > { %v4735_v47 = vpop.f32.mrb[93].mxu0 }
0x1040   : > { %v2968_v50 = vpop.f32.mrb[94].mxu0 }
0x1041   : > { %v4736_v51 = vpop.f32.mrb[95].mxu0 }
0x1049   : > { %v5974_v52 = vpop.f32.mrb[88].mxu1 }
0x104a   : > { %v3067_v53 = vpack.c.bf16 %v5972_v49, %v5974_v52  ;;  %v4729_v54 = vpop.f32.mrb[89].mxu1 }
0x104b   : > { %v2920_v55 = vpop.f32.mrb[90].mxu1 }
0x104c   : > { %v4730_v56 = vpop.f32.mrb[91].mxu1 }
0x1073   : > { %v5978_v18 = vpop.f32.mrb[96].mxu0 }
0x1074   : > { %v4747_v57 = vpop.f32.mrb[97].mxu0 }
0x1075   : > { %v3064_v59 = vpop.f32.mrb[98].mxu0 }
0x1076   : > { %v4748_v60 = vpop.f32.mrb[99].mxu0 }
0x107f   : > { %v3184_v61 = vpop.f32.mrb[100].mxu0 }
0x1080   : > { %v4759_v1 = vpop.f32.mrb[101].mxu0  ;;  %v3295_v2 = vsel %vm509_vm4, %v3184_v61, -inf }
0x1081   : > { %3296 = vmax.xlane.f32.xlu1 %v3295_v2  ;;  %v3187_v5 = vpop.f32.mrb[102].mxu0 }
0x1082   : > { %v5981_v20 = vpop.f32.mrb[92].mxu1  ;;  %v4760_v16 = vpop.f32.mrb[103].mxu0 }
0x1083   : > { %v3068_v15 = vpack.c.bf16 %v5978_v18, %v5981_v20  ;;  %v4741_v24 = vpop.f32.mrb[93].mxu1 }
0x1084   : > { %v3016_v27 = vpop.f32.mrb[94].mxu1 }
0x1085   : > { %v4742_v29 = vpop.f32.mrb[95].mxu1 }
0x1087   : > { %v3286_v32 = vpop.f32.mrb[104].mxu0 }
0x1088   : > { %v4771_v33 = vpop.f32.mrb[105].mxu0  ;;  %v3301_v51 = vsel %vm509_vm4, %v3286_v32, -inf }
0x1089   : > { %v3289_v34 = vpop.f32.mrb[106].mxu0 }
0x108a   : > { %v3133_v37 = vpop.f32.mrb[96].mxu1  ;;  %v4772_v38 = vpop.f32.mrb[107].mxu0 }
0x108b   : > { %v4753_v39 = vpop.f32.mrb[97].mxu1  ;;  %v3292_v40 = vsel %vm509_vm4, %v3133_v37, -inf }
0x108c   : > { %3293 = vmax.xlane.f32.xlu0 %v3292_v40  ;;  %v3136_v42 = vpop.f32.mrb[98].mxu1 }
0x108d   : > { %v4754_v44 = vpop.f32.mrb[99].mxu1 }
0x1092   : > { %3340 = vrot.lane.b32.xlu1 %v5766_v9, %s5283_s24  ;;  %v3235_v45 = vpop.f32.mrb[100].mxu1 }
0x1093   : > { %v4765_v46 = vpop.f32.mrb[101].mxu1  ;;  %v3298_v48 = vsel %vm509_vm4, %v3235_v45, -inf }
0x1094   : > { %3299 = vmax.xlane.f32.xlu0 %v3298_v48  ;;  %v3238_v47 = vpop.f32.mrb[102].mxu1 }
0x1095   : > { %v4766_v50 = vpop.f32.mrb[103].mxu1 }
0x1098   : > { %3302 = vmax.xlane.f32.xlu0 %v3301_v51 }
0x110e   : > { %v3297_v54 = vpop.xlane.xlu1 %3296 }
0x110f   : > { %v3305_v55 = vsub.f32 %v3184_v61, %v3297_v54 }
0x1111   : > { %v3310_v56 = vmul.f32 1.442695, %v3305_v55 }
0x1112   : > { %v3341_v57 = vpop.permute.xlu1 %3340 }
0x1113   : > { %5065 = vpow2.f32 %v3310_v56  ;;  %v3346_v59 = vsel %vm563_vm5, %v3341_v57, 0 }
0x1114   : > { %4774 = vmatpush3.bf16.msra.mxu1 %v3346_v59 }
0x1115   : > { %4785 = vmatprep.subr.bf16.mxu1 %v5262_v13 }
0x1119   : > { %v3294_v60 = vpop.xlane.xlu0 %3293 }
0x111a   : > { %v3304_v1 = vsub.f32 %v3133_v37, %v3294_v60 }
0x111c   : > { %v3308_v2 = vmul.f32 1.442695, %v3304_v1 }
0x111d   : > { %v5066_v5 = vpop.eup %5065 }
0x111e   : > { %5067 = vpow2.f32 %v3308_v2  ;;  %v3319_v16 = vsel %vm509_vm4, %v5066_v5, 0.0 }
0x111f   : > { %3320 = vadd.xlane.f32.xlu0 %v3319_v16 }
0x1121   : > { %v3300_v61 = vpop.xlane.xlu0 %3299 }
0x1122   : > { %v3306_v37 = vsub.f32 %v3235_v45, %v3300_v61 }
0x1124   : > { %v3312_v39 = vmul.f32 1.442695, %v3306_v37 }
0x1125   : > { %v3303_v29 = vpop.xlane.xlu0 %3302 }
0x1126   : > { %v3307_v33 = vsub.f32 %v3286_v32, %v3303_v29 }
0x1128   : > { %v5068_v24 = vpop.eup %5067  ;;  %v3314_v34 = vmul.f32 1.442695, %v3307_v33 }
0x1129   : > { %v3316_v27 = vsel %vm509_vm4, %v5068_v24, 0.0 }
0x112a   : > { %3317 = vadd.xlane.f32.xlu1 %v3316_v27  ;;  %5069 = vpow2.f32 %v3314_v34 }
0x112b   : > { %5071 = vpow2.f32 %v3312_v39 }
0x1134   : > { %v5070_v38 = vpop.eup %5069 }
0x1135   : > { %3388 = vrot.lane.b32.xlu0 %v5770_v19, %s5283_s24  ;;  %v3325_v40 = vsel %vm509_vm4, %v5070_v38, 0.0  ;;  %v5072_v42 = vpop.eup %5071 }
0x1136   : > { %v3322_v44 = vsel %vm509_vm4, %v5072_v42, 0.0 }
0x113b   : > { %3436 = vrot.lane.b32.xlu1 %v5773_v10, %s5283_s24 }
0x113f   : > { %3484 = vrot.lane.b32.xlu1 %v5778_v11, %s5283_s24  ;;  %s6140_s24 = scalar_lea.hbm %s6190_s3, %s4316_s18 }
0x1154   : > { %3326 = vadd.xlane.f32.xlu0 %v3325_v40 }
0x1163   : > { %3323 = vadd.xlane.f32.xlu1 %v3322_v44 }
0x116a   : > { %3556 = vrot.lane.b32.xlu0 %v5766_v9, %s5284_s26 }
0x116e   : > { %3554 = vrot.lane.b32.xlu0 %v5766_v9, %s5285_s27 }
0x1172   : > { %3658 = vrot.lane.b32.xlu0 %v5773_v10, %s5284_s26 }
0x1174   : > { %3607 = vrot.lane.b32.xlu1 %v5770_v19, %s5284_s26 }
0x1176   : > { %3656 = vrot.lane.b32.xlu0 %v5773_v10, %s5285_s27 }
0x1178   : > { %3605 = vrot.lane.b32.xlu1 %v5770_v19, %s5285_s27 }
0x117c   : > { %3709 = vrot.lane.b32.xlu1 %v5778_v11, %s5284_s26  ;;  %s5294_s26 = smov [#allocation10]  }
0x1180   : > { %3707 = vrot.lane.b32.xlu1 %v5778_v11, %s5285_s27  ;;  %s5187_s27 = sshll.u32 %s5294_s26, 4  ;;  %s5188_s27 = int_to_ptr.vmem [resolvable:$false] %s5187_s27 }
0x1181   : > { %p5190_p7 = scmp.lt.s32.totalorder %s6134_s30, %s5188_s27 }
0x11ac   : > { %v3321_v32 = vpop.xlane.xlu0 %3320 }
0x11ad   : > { %5073 = vrcp.f32 %v3321_v32 }
0x11b0   : > { %v3389_v45 = vpop.permute.xlu0 %3388 }
0x11b1   : > { %v3394_v46 = vsel %vm563_vm5, %v3389_v45, 0 }
0x11b2   : > { %4780 = vmatpush3.bf16.msra.mxu0 %v3394_v46 }
0x11b3   : > { %4791 = vmatprep.subr.bf16.mxu0 %v5262_v13 }
0x11b7   : > { %v5074_v48 = vpop.eup %5073  ;;  %v3318_v47 = vpop.xlane.xlu1 %3317 }
0x11b8   : > { %v3333_v50 = vmul.f32 %v5074_v48, %v5066_v5  ;;  %5075 = vrcp.f32 %v3318_v47 }
0x11ba   : > { %v3337_v51 = vpack.c.bf16 %v3333_v50, %v3333_v50 }
0x11bb   : > { %v3437_v54 = vpop.permute.xlu1 %3436 }
0x11bc   : > { %4782 = vmatmul.mubr.msk.bf16.vlgmr.msra.gmra.mrb[108].mxu0 %vm509_vm4, %v3337_v51  ;;  %v3442_v1 = vsel %vm563_vm5, %v3437_v54, 0 }
0x11bd   : > { %4793 = vmatprep.mubr.msk.bf16.mxu0 %vm5263_vm2, %v5262_v13 }
0x11bf   : > { %v3485_v55 = vpop.permute.xlu1 %3484 }
0x11c0   : > { %v3490_v56 = vsel %vm563_vm5, %v3485_v55, 0 }
0x11c1   : > { %4792 = vmatpush3.bf16.msra.mxu0 %v3490_v56 }
0x11c2   : > { %v5076_v57 = vpop.eup %5075  ;;  %4803 = vmatprep.subr.bf16.mxu0 %v5262_v13 }
0x11c3   : > { %v3332_v59 = vmul.f32 %v5076_v57, %v5068_v24 }
0x11c5   : > { %v3336_v60 = vpack.c.bf16 %v3332_v59, %v3332_v59 }
0x11c7   : > { %4776 = vmatmul.mubr.msk.bf16.vlgmr.msra.gmra.mrb[104].mxu1 %vm509_vm4, %v3336_v60 }
0x11c8   : > { %4786 = vmatpush3.bf16.msra.mxu1 %v3442_v1  ;;  %4787 = vmatprep.mubr.msk.bf16.mxu1 %vm5263_vm2, %v5262_v13 }
0x11c9   : > { %4797 = vmatprep.subr.bf16.mxu1 %v5262_v13 }
0x11e1   : > { %v3327_v2 = vpop.xlane.xlu0 %3326 }
0x11e2   : > { %5077 = vrcp.f32 %v3327_v2 }
0x11e5   : > { %v3557_v34 = vpop.permute.xlu0 %3556 }
0x11e6   : > { %v3562_v45 = vsel %vm318_vm3, %v3557_v34, 0 }
0x11e9   : > { %v3555_v32 = vpop.permute.xlu0 %3554 }
0x11ec   : > { %v5078_v5 = vpop.eup %5077 }
0x11ed   : > { %v3335_v16 = vmul.f32 %v5078_v5, %v5070_v38  ;;  %v3659_v46 = vpop.permute.xlu0 %3658 }
0x11ee   : > { %v3664_v48 = vsel %vm318_vm3, %v3659_v46, 0 }
0x11ef   : > { %v3339_v27 = vpack.c.bf16 %v3335_v16, %v3335_v16 }
0x11f0   : > { %v3324_v61 = vpop.xlane.xlu1 %3323 }
0x11f1   : > { %5079 = vrcp.f32 %v3324_v61  ;;  %4794 = vmatmul.mubr.msk.bf16.vlgmr.msra.gmra.mrb[112].mxu0 %vm509_vm4, %v3339_v27  ;;  %v3657_v47 = vpop.permute.xlu0 %3656 }
0x11f2   : > { %4805 = vmatprep.mubr.msk.bf16.mxu0 %vm5263_vm2, %v5262_v13 }
0x11f4   : > { %v3608_v24 = vpop.permute.xlu1 %3607 }
0x11f5   : > { %v3613_v29 = vsel %vm318_vm3, %v3608_v24, 0 }
0x11f6   : > { %4804 = vmatpush3.bf16.xpose.msra.mxu0 %v3613_v29 }
0x11f7   : > { %4815 = vmatprep.subr.bf16.mxu0 %v5262_v13 }
0x11f8   : > { %v3606_v33 = vpop.permute.xlu1 %3605 }
0x11fb   : > { %v5080_v37 = vpop.eup %5079 }
0x11fc   : > { %v3334_v39 = vmul.f32 %v5080_v37, %v5072_v42  ;;  %v3710_v40 = vpop.permute.xlu1 %3709 }
0x11fd   : > { %v3715_v38 = vsel %vm318_vm3, %v3710_v40, 0  ;;  %4806 = vmatmul.mubr.msk.bf16.vlgmr.msra.gmra.mrb[116].mxu0 %vm318_vm3, %v3606_v33 }
0x11fe   : > { %4816 = vmatpush3.bf16.xpose.msra.mxu0 %v3715_v38  ;;  %v3338_v44 = vpack.c.bf16 %v3334_v39, %v3334_v39  ;;  %4817 = vmatprep.mubr.msk.bf16.mxu0 %vm5263_vm2, %v5262_v13 }
0x11ff   : > { %4827 = vmatprep.subr.bf16.mxu0 %v5262_v13 }
0x1200   : > { %4788 = vmatmul.mubr.msk.bf16.vlgmr.msra.gmra.mrb[108].mxu1 %vm509_vm4, %v3338_v44  ;;  %v3708_v42 = vpop.permute.xlu1 %3707 }
0x1201   : > { %4798 = vmatpush3.bf16.xpose.msra.mxu1 %v3562_v45  ;;  %4799 = vmatprep.mubr.msk.bf16.mxu1 %vm5263_vm2, %v5262_v13 }
0x1202   : > { %4809 = vmatprep.subr.bf16.mxu1 %v5262_v13 }
0x1205   : > { %4818 = vmatmul.mubr.msk.bf16.vlgmr.msra.gmra.mrb[120].mxu0 %vm318_vm3, %v3708_v42 }
0x1206   : > { %4829 = vmatprep.mubr.msk.bf16.mxu0 %vm5263_vm2, %v5262_v13 }
0x1208   : > { %4800 = vmatmul.mubr.msk.bf16.vlgmr.msra.gmra.mrb[112].mxu1 %vm318_vm3, %v3555_v32 }
0x1209   : > { %4810 = vmatpush3.bf16.xpose.msra.mxu1 %v3664_v48  ;;  %4811 = vmatprep.mubr.msk.bf16.mxu1 %vm5263_vm2, %v5262_v13 }
0x120a   : > { %4821 = vmatprep.subr.bf16.mxu1 %v5262_v13 }
0x1210   : > { %4812 = vmatmul.mubr.msk.bf16.vlgmr.msra.gmra.mrb[116].mxu1 %vm318_vm3, %v3657_v47 }
0x1211   : > { %4823 = vmatprep.mubr.msk.bf16.mxu1 %vm5263_vm2, %v5262_v13 }
0x128f   : > { %v6048_v50 = vpop.f32.mrb[108].mxu0 }
0x1290   : > { %v4783_v51 = vpop.f32.mrb[109].mxu0 }
0x1291   : > { %v3433_v54 = vpop.f32.mrb[110].mxu0 }
0x1292   : > { %v4784_v55 = vpop.f32.mrb[111].mxu0 }
0x129a   : > { %v6050_v56 = vpop.f32.mrb[104].mxu1 }
0x129b   : > { %v3532_v57 = vpack.c.bf16 %v6048_v50, %v6050_v56  ;;  %v4777_v59 = vpop.f32.mrb[105].mxu1 }
0x129c   : > { %v3385_v60 = vpop.f32.mrb[106].mxu1 }
0x129d   : > { %v4778_v1 = vpop.f32.mrb[107].mxu1 }
0x12c4   : > { %v6054_v2 = vpop.f32.mrb[112].mxu0 }
0x12c5   : > { %v4795_v5 = vpop.f32.mrb[113].mxu0 }
0x12c6   : > { %v3529_v16 = vpop.f32.mrb[114].mxu0 }
0x12c7   : > { %v4796_v27 = vpop.f32.mrb[115].mxu0 }
0x12d0   : > { %v3649_v61 = vpop.f32.mrb[116].mxu0 }
0x12d1   : > { %v4807_v24 = vpop.f32.mrb[117].mxu0  ;;  %v3760_v29 = vsel %vm509_vm4, %v3649_v61, -inf }
0x12d2   : > { %3761 = vmax.xlane.f32.xlu1 %v3760_v29  ;;  %v3652_v33 = vpop.f32.mrb[118].mxu0 }
0x12d3   : > { %v6057_v34 = vpop.f32.mrb[108].mxu1  ;;  %v4808_v37 = vpop.f32.mrb[119].mxu0 }
0x12d4   : > { %v3533_v39 = vpack.c.bf16 %v6054_v2, %v6057_v34  ;;  %v4789_v40 = vpop.f32.mrb[109].mxu1  ;;  %v4967_v34 = vld [vmem:[#allocation9] sm:$0xff]  }
0x12d5   : > { %v3481_v38 = vpop.f32.mrb[110].mxu1 }
0x12d6   : > { %v4790_v44 = vpop.f32.mrb[111].mxu1 }
0x12d8   : > { %v3751_v32 = vpop.f32.mrb[120].mxu0 }
0x12d9   : > { %v4819_v45 = vpop.f32.mrb[121].mxu0  ;;  %v3766_v27 = vsel %vm509_vm4, %v3751_v32, -inf }
0x12da   : > { %v3754_v42 = vpop.f32.mrb[122].mxu0 }
0x12db   : > { %v3598_v46 = vpop.f32.mrb[112].mxu1  ;;  %v4820_v48 = vpop.f32.mrb[123].mxu0 }
0x12dc   : > { %v4801_v47 = vpop.f32.mrb[113].mxu1  ;;  %v3757_v51 = vsel %vm509_vm4, %v3598_v46, -inf }
0x12dd   : > { %3758 = vmax.xlane.f32.xlu0 %v3757_v51  ;;  %v3601_v54 = vpop.f32.mrb[114].mxu1 }
0x12de   : > { %v4802_v55 = vpop.f32.mrb[115].mxu1 }
0x12e3   : > { %3805 = vrot.lane.b32.xlu1 %v5766_v9, %s5286_s23  ;;  %v3700_v59 = vpop.f32.mrb[116].mxu1 }
0x12e4   : > { %v4813_v60 = vpop.f32.mrb[117].mxu1  ;;  %v3763_v1 = vsel %vm509_vm4, %v3700_v59, -inf }
0x12e5   : > { %3764 = vmax.xlane.f32.xlu0 %v3763_v1  ;;  %v3703_v5 = vpop.f32.mrb[118].mxu1 }
0x12e6   : > { %v4814_v16 = vpop.f32.mrb[119].mxu1 }
0x12e9   : > { %3767 = vmax.xlane.f32.xlu0 %v3766_v27 }
0x135f   : > { %v3762_v24 = vpop.xlane.xlu1 %3761 }
0x1360   : > { %v3770_v29 = vsub.f32 %v3649_v61, %v3762_v24 }
0x1362   : > { %v3775_v33 = vmul.f32 1.442695, %v3770_v29 }
0x1363   : > { %v3806_v37 = vpop.permute.xlu1 %3805 }
0x1364   : > { %5081 = vpow2.f32 %v3775_v33  ;;  %v3811_v40 = vsel %vm563_vm5, %v3806_v37, 0 }
0x1365   : > { %4822 = vmatpush3.bf16.msra.mxu1 %v3811_v40 }
0x1366   : > { %4833 = vmatprep.subr.bf16.mxu1 %v5262_v13 }
0x136a   : > { %v3759_v9 = vpop.xlane.xlu0 %3758 }
0x136b   : > { %v3769_v38 = vsub.f32 %v3598_v46, %v3759_v9 }
0x136d   : > { %v3773_v44 = vmul.f32 1.442695, %v3769_v38 }
0x136e   : > { %v5082_v45 = vpop.eup %5081 }
0x136f   : > { %5083 = vpow2.f32 %v3773_v44  ;;  %v3784_v42 = vsel %vm509_vm4, %v5082_v45, 0.0 }
0x1370   : > { %3785 = vadd.xlane.f32.xlu0 %v3784_v42 }
0x1372   : > { %v3765_v48 = vpop.xlane.xlu0 %3764 }
0x1373   : > { %v3771_v47 = vsub.f32 %v3700_v59, %v3765_v48 }
0x1375   : > { %v3777_v51 = vmul.f32 1.442695, %v3771_v47 }
0x1376   : > { %v3768_v61 = vpop.xlane.xlu0 %3767 }
0x1377   : > { %5085 = vpow2.f32 %v3777_v51  ;;  %v3772_v54 = vsub.f32 %v3751_v32, %v3768_v61 }
0x1379   : > { %v5084_v55 = vpop.eup %5083  ;;  %v3779_v60 = vmul.f32 1.442695, %v3772_v54 }
0x137a   : > { %v3781_v1 = vsel %vm509_vm4, %v5084_v55, 0.0 }
0x137b   : > { %5087 = vpow2.f32 %v3779_v60  ;;  %3782 = vadd.xlane.f32.xlu1 %v3781_v1 }
0x1381   : > { %v5086_v5 = vpop.eup %5085 }
0x1382   : > { %v3787_v46 = vsel %vm509_vm4, %v5086_v5, 0.0 }
0x1383   : > { %3788 = vadd.xlane.f32.xlu1 %v3787_v46 }
0x1385   : > { %v5088_v16 = vpop.eup %5087 }
0x1386   : > { %v3790_v27 = vsel %vm509_vm4, %v5088_v16, 0.0 }
0x1387   : > { %3791 = vadd.xlane.f32.xlu0 %v3790_v27 }
0x1394   : > { %3901 = vrot.lane.b32.xlu1 %v5773_v10, %s5286_s23 }
0x1398   : > { %3949 = vrot.lane.b32.xlu1 %v5778_v11, %s5286_s23 }
0x139c   : > { %1213 = vrot.lane.b32.xlu1 %v1208_v36, %s5287_s5 }
0x139d   : > { %3853 = vrot.lane.b32.xlu0 %v5770_v19, %s5286_s23  ;;  %s5189_s23 = scalar_lea.vmem %s5188_s27, 1024 }
0x139e   : > { %p5191_p9 = scmp.lt.s32.totalorder %s5189_s23, %s5183_s22 }
0x13a0   : > { %1678 = vrot.lane.b32.xlu1 %v1673_v14, %s5288_s10  ;;  %p5192_p12 = por %p5191_p9, %p5190_p7 }
0x13a1   : > { %1211 = vrot.lane.b32.xlu0 %v1207_v25, %s5287_s5 }
0x13a2   : > { %p5193_p2 = pnand %p5192_p12, %p5186_p3 }
0x13a4   : > { %2143 = vrot.lane.b32.xlu1 %v2138_v28, %s5289_s11 }
0x13a5   : > { %1676 = vrot.lane.b32.xlu0 %v1672_v4, %s5288_s10 }
0x13a8   : > { %2608 = vrot.lane.b32.xlu1 %v2603_v43, %s5290_s25 }
0x13a9   : > { %2141 = vrot.lane.b32.xlu0 %v2137_v0, %s5289_s11 }
0x13ac   : > { %3073 = vrot.lane.b32.xlu1 %v3068_v15, %s5291_s7 }
0x13ad   : > { %2606 = vrot.lane.b32.xlu0 %v2602_v21, %s5290_s25 }
0x13b0   : > { %3538 = vrot.lane.b32.xlu1 %v3533_v39, %s5292_s8  ;;  %v4968_v39 = vld [vmem:[#allocation9 + $0x8] sm:$0xff]  }
0x13b1   : > { %3071 = vrot.lane.b32.xlu0 %v3067_v53, %s5291_s7 }
0x13b5   : > { %3536 = vrot.lane.b32.xlu0 %v3532_v57, %s5292_s8 }
0x13fd   : > { %v3786_v22 = vpop.xlane.xlu0 %3785 }
0x1408   : > { %v3783_v23 = vpop.xlane.xlu1 %3782 }
0x1409   : > { %5089 = vrcp.f32 %v3783_v23 }
0x140a   : > { %5091 = vrcp.f32 %v3786_v22 }
0x1410   : > { %v3789_v25 = vpop.xlane.xlu1 %3788 }
0x1411   : > { %5093 = vrcp.f32 %v3789_v25 }
0x1413   : > { %v5090_v31 = vpop.eup %5089 }
0x1414   : > { %v5092_v35 = vpop.eup %5091  ;;  %v3797_v36 = vmul.f32 %v5090_v31, %v5084_v55  ;;  %v3902_v63 = vpop.permute.xlu1 %3901 }
0x1415   : > { %v3792_v3 = vpop.xlane.xlu0 %3791  ;;  %v3798_v8 = vmul.f32 %v5092_v35, %v5082_v45  ;;  %v3907_v12 = vsel %vm563_vm5, %v3902_v63, 0 }
0x1416   : > { %5095 = vrcp.f32 %v3792_v3  ;;  %v3801_v4 = vpack.c.bf16 %v3797_v36, %v3797_v36 }
0x1417   : > { %v3802_v58 = vpack.c.bf16 %v3798_v8, %v3798_v8 }
0x1418   : > { %4824 = vmatmul.mubr.msk.bf16.vlgmr.msra.gmra.mrb[120].mxu1 %vm509_vm4, %v3801_v4  ;;  %v3950_v14 = vpop.permute.xlu1 %3949 }
0x1419   : > { %v3854_v19 = vpop.permute.xlu0 %3853  ;;  %4834 = vmatpush3.bf16.msra.mxu1 %v3907_v12  ;;  %4835 = vmatprep.mubr.msk.bf16.mxu1 %vm5263_vm2, %v5262_v13  ;;  %v3955_v26 = vsel %vm563_vm5, %v3950_v14, 0 }
0x141a   : > { %v3859_v10 = vsel %vm563_vm5, %v3854_v19, 0  ;;  %4845 = vmatprep.subr.bf16.mxu1 %v4967_v34 }
0x141b   : > { %4828 = vmatpush3.bf16.msra.mxu0 %v3859_v10  ;;  %v5094_v11 = vpop.eup %5093 }
0x141c   : > { %4839 = vmatprep.subr.bf16.mxu0 %v5262_v13  ;;  %v3799_v62 = vmul.f32 %v5094_v11, %v5086_v5  ;;  %v1214_v0 = vpop.permute.xlu1 %1213 }
0x141d   : > { %v1212_v6 = vpop.permute.xlu0 %1211  ;;  %1219 = vst.msk [vmem:[#allocation3 + $0x8] sm:$0xff] %vm1217_vm6, %v1214_v0 }
0x141e   : > { %1218 = vst.msk [vmem:[#allocation3] sm:$0xff] %vm1217_vm6, %v1212_v6  ;;  %4830 = vmatmul.mubr.msk.bf16.vlgmr.msra.gmra.mrb[124].mxu0 %vm509_vm4, %v3802_v58  ;;  %v3803_v28 = vpack.c.bf16 %v3799_v62, %v3799_v62 }
0x141f   : > { %4840 = vmatpush3.bf16.msra.mxu0 %v3955_v26  ;;  %4841 = vmatprep.mubr.msk.bf16.mxu0 %vm5263_vm2, %v5262_v13 }
0x1420   : > { %v5096_v7 = vpop.eup %5095  ;;  %4836 = vmatmul.mubr.msk.bf16.vlgmr.msra.gmra.mrb[124].mxu1 %vm509_vm4, %v3803_v28  ;;  %v1679_v21 = vpop.permute.xlu1 %1678 }
0x1421   : > { %v3800_v17 = vmul.f32 %v5096_v7, %v5088_v16  ;;  %v1677_v30 = vpop.permute.xlu0 %1676  ;;  %1684 = vst.msk [vmem:[#allocation3 + $0x8] sm:$0xff] %vm1682_vm7, %v1679_v21  ;;  %4846 = vmatpush3.bf16.msra.mxu1 %v4967_v34 }
0x1422   : > { %1683 = vst.msk [vmem:[#allocation3] sm:$0xff] %vm1682_vm7, %v1677_v30  ;;  %4847 = vmatprep.subr.bf16.mxu1 %v4968_v39 }
0x1423   : > { %v3804_v41 = vpack.c.bf16 %v3800_v17, %v3800_v17 }
0x1424   : > { %v2144_v43 = vpop.permute.xlu1 %2143 }
0x1425   : > { %v2142_v49 = vpop.permute.xlu0 %2141  ;;  %2149 = vst.msk [vmem:[#allocation3 + $0x8] sm:$0xff] %vm2147_vm8, %v2144_v43  ;;  %4848 = vmatpush3.bf16.msra.mxu1 %v4968_v39 }
0x1426   : > { %2148 = vst.msk [vmem:[#allocation3] sm:$0xff] %vm2147_vm8, %v2142_v49  ;;  %4842 = vmatmul.mubr.msk.bf16.vlgmr.msra.gmra.mrb[128].mxu0 %vm509_vm4, %v3804_v41 }
0x1428   : > { %v2609_v52 = vpop.permute.xlu1 %2608 }
0x1429   : > { %v2607_v53 = vpop.permute.xlu0 %2606  ;;  %2614 = vst.msk [vmem:[#allocation3 + $0x8] sm:$0xff] %vm2612_vm9, %v2609_v52 }
0x142a   : > { %2613 = vst.msk [vmem:[#allocation3] sm:$0xff] %vm2612_vm9, %v2607_v53 }
0x142c   : > { %v3074_v13 = vpop.permute.xlu1 %3073 }
0x142d   : > { %v3072_v18 = vpop.permute.xlu0 %3071  ;;  %3079 = vst.msk [vmem:[#allocation3 + $0x8] sm:$0xff] %vm3077_vm10, %v3074_v13 }
0x142e   : > { %3078 = vst.msk [vmem:[#allocation3] sm:$0xff] %vm3077_vm10, %v3072_v18 }
0x1430   : > { %v3539_v20 = vpop.permute.xlu1 %3538 }
0x1431   : > { %v3537_v15 = vpop.permute.xlu0 %3536  ;;  %3544 = vst.msk [vmem:[#allocation3 + $0x8] sm:$0xff] %vm3542_vm11, %v3539_v20 }
0x1432   : > { %3543 = vst.msk [vmem:[#allocation3] sm:$0xff] %vm3542_vm11, %v3537_v15 }
0x14eb   : > { %v3847_v50 = vpop.f32.mrb[120].mxu1 }
0x14ec   : > { %v4825_v56 = vpop.f32.mrb[121].mxu1 }
0x14ed   : > { %v3850_v57 = vpop.f32.mrb[122].mxu1 }
0x14ee   : > { %v4826_v2 = vpop.f32.mrb[123].mxu1 }
0x14f1   : > { %v3895_v32 = vpop.f32.mrb[124].mxu0 }
0x14f2   : > { %v3997_v59 = vpack.c.bf16 %v3895_v32, %v3847_v50  ;;  %v4831_v24 = vpop.f32.mrb[125].mxu0 }
0x14f3   : > { %v3898_v29 = vpop.f32.mrb[126].mxu0  ;;  %v3943_v33 = vpop.f32.mrb[124].mxu1 }
0x14f4   : > { %4001 = vrot.lane.b32.xlu0 %v3997_v59, %s5293_s21  ;;  %v4832_v37 = vpop.f32.mrb[127].mxu0  ;;  %v4837_v40 = vpop.f32.mrb[125].mxu1 }
0x14f5   : > { %v3946_v9 = vpop.f32.mrb[126].mxu1 }
0x14f6   : > { %v4838_v38 = vpop.f32.mrb[127].mxu1 }
0x14f9   : > { %v3991_v44 = vpop.f32.mrb[128].mxu0 }
0x14fa   : > { %v3998_v45 = vpack.c.bf16 %v3991_v44, %v3943_v33  ;;  %v4843_v42 = vpop.f32.mrb[129].mxu0 }
0x14fb   : > { %v3994_v48 = vpop.f32.mrb[130].mxu0 }
0x14fc   : > { %4003 = vrot.lane.b32.xlu1 %v3998_v45, %s5293_s21  ;;  %v4844_v47 = vpop.f32.mrb[131].mxu0 }
0x1566   : > { %v4002_v51 = vpop.permute.xlu0 %4001 }
0x1567   : > { %4008 = vst.msk [vmem:[#allocation3] sm:$0xff] %vm4007_vm12, %v4002_v51 }
0x156e   : > { %v4004_v61 = vpop.permute.xlu1 %4003  ;;  %v4010_v54 = vld [vmem:[#allocation3] sm:$0xff] }
0x156f   : > { %4009 = vst.msk [vmem:[#allocation3 + $0x8] sm:$0xff] %vm4007_vm12, %v4004_v61  ;;  %4849 = vmatprep.mubr.msk.bf16.mxu1 %vm243_vm0, %v4010_v54 }
0x1576   : > { %v4011_v55 = vld [vmem:[#allocation3 + $0x8] sm:$0xff] }
0x1577   : > { %4850 = vmatmul.mubr.msk.bf16.vlgmr.msra.gmra.mrb[128].mxu1 %vm243_vm0, %v4011_v55 }
0x164a   : > { %v4851_v60 = vpop.f32.mrb[128].mxu1 }
0x164b   : > { %4085 = vst.msk [vmem:[%s217_s29 + $0x10] sm:$0xff] %vm243_vm0, %v4851_v60  ;;  %v4068_v1 = vpop.f32.mrb[129].mxu1 }
0x164c   : > { %4083 = vst.msk [vmem:[%s217_s29] sm:$0xff] %vm243_vm0, %v4068_v1  ;;  %v4852_v5 = vpop.f32.mrb[130].mxu1 }
0x164d   : > { %4086 = vst.msk [vmem:[%s217_s29 + $0x18] sm:$0xff] %vm243_vm0, %v4852_v5  ;;  %v4071_v46 = vpop.f32.mrb[131].mxu1 }
0x164e   : > { %4084 = vst.msk [vmem:[%s217_s29 + $0x8] sm:$0xff] %vm243_vm0, %v4071_v46 }
0x164f   : > { %5196 = shalt.err (!%p5193_p2)
}
0x1650   : > { %s5197_s5 = scalar_lea.hbm %s6140_s24, 512  ;;  %s5201_s7 = scalar_lea.hbm %s6190_s3, 1024 }
0x1651   : > { %p5198_p13 = scmp.ne.s32.totalorder %s6140_s24, %s5197_s5  ;;  %p5202_p4 = scmp.lt.u32.totalorder %s6140_s24, %s6190_s3 }
0x1652   : > { %p5203_p5 = scmp.lt.u32.totalorder %s5201_s7, %s5197_s5  ;;  %p5205_p11 = scmp.lt.u32.totalorder %s5197_s5, %s6140_s24 }
0x1653   : > { %p5199_p6 = pnand %p5198_p13, %p6204_p0 }
0x1654   : > { %p5204_p8 = por %p5203_p5, %p5202_p4 }
0x1655   : > { %p5200_p10 = pneg %p5199_p6 }
0x1656   : > { %p5206_p1 = por %p5205_p11, %p5204_p8 }
0x1658   : > { %p5207_p3 = pnand %p5206_p1, %p5200_p10 }
0x165a   : > { %5210 = shalt.err (!%p5207_p3)
}
0x165b   : > { %s5295_s29 = smov 128  }
0x165c   : > { %4863 = dma.vmem_to_hbm [thread:$0]  (%p6204_p0), %s6134_s30, 512, %s6140_s24, %s4088_s16, %s5295_s29, %s5295_s29, %s5288_s10  }
0x165d PF: > { %s4116_s18 = sand.u32 1, %s5241_s12   ;;  %p6205_p7 = scmp.ne.s32.totalorder %s6195_s19, 0 }
0x165e   : > { %p6206_p9 = scmp.ge.s32.totalorder %s5253_s15, 2  ;;  %s4117_s20 = scalar_lea.sflag [#allocation6], %s4116_s18 }
0x1660   : > { %p4877_p12 = pnand %p6206_p9, %p6205_p7 }
0x1662   : > { %5236 = dma.done.wait (!%p4877_p12), %s4117_s20, 512  }
0x1663   : > { %5238 = vsyncadd (!%p4877_p12), %s4117_s20, 4294966784  ;;  %p17_p2 = scmp.ge.s32.totalorder %s5426_s4, 4   ;;  %s6207_s12 = smov %s5245_s13 }
0x1664   : > { %s6208_s13 = smov %s5249_s14  ;;  %s6209_s14 = smov %s5442_s9 }
0x1665   : > { %s6210_s15 = smov %s5426_s4  ;;  %19 = sbr.rel (!%p17_p2) target bundleno = 6 (0x6), region = 85 }
0x166c   :  { %4122 = vsyncpa [#allocation5], 1 }
0x166d   :  { %4124 = vsyncpa [#allocation5 + $0x1], 1 }
0x166e   :  { %4125 = vsyncpa [#allocation8], 1 }
0x166f   :  { %4126 = vsyncpa [#allocation6], 1 }
0x1670   :  { %4128 = vsyncpa [#allocation6 + $0x1], 1 }

</bundles_post_ra>
